<compile_context>
chip_gen: v7x
topology: tpu7x:2x2x1
jax: 0.10.0
libtpu: 0.0.40
codegen_flags: <defaults>
</compile_context>

<pallas_src>
import functools

import jax
import jax.numpy as jnp
from jax.experimental import pallas as pl
from jax.experimental.pallas import tpu as pltpu


# ----------------------------------------------------------------------------
# Plain-JAX glue: bilinear grid_sample, padding_mode='border', align_corners=False
# ----------------------------------------------------------------------------
def grid_sample_bilinear_border(feat, grid):
    """feat: [B, C, H, W], grid: [B, Ho, Wo, 2] in [-1, 1] -> [B, C, Ho, Wo]."""
    B, C, H, W = feat.shape
    _, Ho, Wo, _ = grid.shape
    gx = grid[..., 0]
    gy = grid[..., 1]
    # align_corners=False mapping from [-1, 1] to pixel coords
    x = ((gx + 1.0) * W - 1.0) * 0.5
    y = ((gy + 1.0) * H - 1.0) * 0.5
    # border padding: clamp coordinates
    x = jnp.clip(x, 0.0, W - 1.0)
    y = jnp.clip(y, 0.0, H - 1.0)
    x0f = jnp.floor(x)
    y0f = jnp.floor(y)
    wx = x - x0f
    wy = y - y0f
    x0 = jnp.clip(x0f, 0, W - 1).astype(jnp.int32)
    x1 = jnp.clip(x0f + 1.0, 0, W - 1).astype(jnp.int32)
    y0 = jnp.clip(y0f, 0, H - 1).astype(jnp.int32)
    y1 = jnp.clip(y0f + 1.0, 0, H - 1).astype(jnp.int32)

    flat = feat.reshape(B, C, H * W)

    def gather(yi, xi):
        idx = (yi * W + xi).reshape(B, 1, Ho * Wo)
        idx = jnp.broadcast_to(idx, (B, C, Ho * Wo))
        return jnp.take_along_axis(flat, idx, axis=2).reshape(B, C, Ho, Wo)

    v00 = gather(y0, x0)
    v01 = gather(y0, x1)
    v10 = gather(y1, x0)
    v11 = gather(y1, x1)
    wx = wx[:, None, :, :]
    wy = wy[:, None, :, :]
    return (v00 * (1.0 - wx) * (1.0 - wy)
            + v01 * wx * (1.0 - wy)
            + v10 * (1.0 - wx) * wy
            + v11 * wx * wy)


# ----------------------------------------------------------------------------
# Pallas kernel: group correlation (folded into conv0) + 1x1 Conv3d MLP + sigmoid
# ----------------------------------------------------------------------------
def featureweight_kernel(samp_ref, rf_ref,
                         w0_ref, b0_ref,
                         w1_ref, b1_ref,
                         ws_ref, bs_ref, o_ref):
    # samp block: (1, C, nt*P) bf16, rf block: (1, C, P) bf16.
    P = rf_ref.shape[-1]
    nt = samp_ref.shape[-1] // P

    rf = rf_ref[0]                    # (C, P)  bf16, resident across the chunk
    w0 = w0_ref[...]                  # (16, C) bf16 (BN scale + 1/Cg folded)
    w1 = w1_ref[...]                  # (8, 16) bf16 (BN scale folded)
    b0 = b0_ref[...]                  # (16, 1) f32 shift
    b1 = b1_ref[...]                  # (8, 1)  f32 shift
    ws = ws_ref[...]                  # (8, 1)  f32
    bs = bs_ref[...]                  # (1, 1)  f32

    # Per-neighbour lane slices: avoids replicating rf across the chunk and
    # keeps every intermediate at lane width P (small, VMEM-friendly).
    for i in range(nt):
        sl = pl.ds(i * P, P)          # static, 128-aligned (P padded to 128x)
        prod = samp_ref[0, :, sl] * rf                    # bf16 VPU product

        # conv0: bf16 MXU operands, f32 accumulate, shift + ReLU
        h0 = jnp.dot(w0, prod, preferred_element_type=jnp.float32)
        h0 = jnp.maximum(h0 + b0, 0.0)                    # (16, P) f32

        # conv1: bf16 MXU operands, f32 accumulate, shift + ReLU
        h1 = jnp.dot(w1, h0.astype(w1.dtype),
                     preferred_element_type=jnp.float32)
        h1 = jnp.maximum(h1 + b1, 0.0)                    # (8, P) f32

        # similarity / conv2: broadcast FMA + sublane reduce (no M=1 MXU op)
        sim = jnp.sum(h1 * ws, axis=0, keepdims=True) + bs
        o_ref[0, :, sl] = jax.nn.sigmoid(sim)             # (1, P) f32


# ----------------------------------------------------------------------------
# VMEM-aware neighbour-chunk selection
# ----------------------------------------------------------------------------
def _vmem_capacity_bytes():
    try:
        info = pltpu.get_tpu_info()
        return int(getattr(info, "vmem_capacity_bytes", 64 << 20))
    except Exception:
        return 64 << 20


def _pick_neighbor_tile(num_neighbors, pixels, channels, in_bytes):
    """Largest divisor nt of num_neighbors whose FULL per-step VMEM footprint
    (double-buffered samp + rf + out blocks plus in-kernel temporaries) fits a
    per-generation budget derived from the chip's VMEM capacity."""
    cap = _vmem_capacity_bytes()
    budget = max(cap // 4, 8 << 20)

    def footprint(nt):
        samp = 2 * channels * nt * pixels * in_bytes      # double-buffered input
        refb = 2 * channels * pixels * in_bytes           # resident rf (2 bufs)
        outb = 2 * nt * pixels * 4                        # f32 output blocks
        temps = pixels * (channels * in_bytes             # prod slice
                          + (16 + 16 + 8 + 8 + 1) * 4)    # h0/h1/sim temps
        return samp + refb + outb + temps

    nt = num_neighbors
    while nt > 1 and (num_neighbors % nt or footprint(nt) > budget):
        nt -= 1
    vmem_limit = int(min(cap, max(footprint(nt) + (8 << 20), 32 << 20)))
    return nt, vmem_limit


def prepare_kernel_params(params, channels_per_group, compute_dtype):
    """Fold BN scales and the 1/Cg group-mean into the conv weights; narrow the
    matmul weights to the streamed compute dtype (bf16)."""
    w0, s0, b0, w1, s1, b1, ws, bs = params
    cg = channels_per_group
    w0_exp = (jnp.repeat(w0 * s0, cg, axis=1) / cg).astype(compute_dtype)  # (16, C)
    w1_f = (w1 * s1).astype(compute_dtype)                                 # (8, 16)
    ws_col = ws.T.astype(jnp.float32)                                      # (8, 1)
    return (w0_exp, b0.astype(jnp.float32), w1_f, b1.astype(jnp.float32),
            ws_col, bs.astype(jnp.float32))


@functools.partial(jax.jit,
                   static_argnames=("neighbors", "group_size", "compute_dtype"))
def feature_weight_net(ref_feature, grid, params, neighbors, group_size,
                       compute_dtype=jnp.bfloat16):
    """ref_feature: [B, C, H, W] (NCHW, like PyTorch); grid: [B, N*H, W, 2]."""
    B, C, H, W = ref_feature.shape
    N = neighbors
    P = H * W
    # Lane-density guarantee: pad the pixel axis to a multiple of 128 so every
    # BlockSpec last dim is 128-aligned and output stores stay unmasked.
    P_pad = ((P + 127) // 128) * 128

    # Glue: bilinear sampling; keep the natural contiguous neighbour-major
    # layout (no transpose), narrow the big streams to bf16 for DMA + MXU.
    sampled = grid_sample_bilinear_border(ref_feature, grid)       # (B, C, N*H, W)
    sampled = sampled.reshape(B, C, N, P)
    ref = ref_feature.reshape(B, C, 1, P)
    if P_pad != P:
        pad = ((0, 0), (0, 0), (0, 0), (0, P_pad - P))
        sampled = jnp.pad(sampled, pad)
        ref = jnp.pad(ref, pad)
    sampled = sampled.reshape(B, C, N * P_pad).astype(compute_dtype)
    ref = ref.reshape(B, C, P_pad).astype(compute_dtype)

    w0e, b0, w1f, b1, wsc, bs = prepare_kernel_params(
        params, C // group_size, compute_dtype)

    in_bytes = jnp.dtype(compute_dtype).itemsize
    nt, vmem_limit = _pick_neighbor_tile(N, P_pad, C, in_bytes)
    T = N // nt

    out = pl.pallas_call(
        featureweight_kernel,
        out_shape=jax.ShapeDtypeStruct((B, 1, N * P_pad), jnp.float32),
        grid=(B, T),
        in_specs=[
            pl.BlockSpec((1, C, nt * P_pad), lambda b, t: (b, 0, t)),
            pl.BlockSpec((1, C, P_pad), lambda b, t: (b, 0, 0)),
            pl.BlockSpec((16, C), lambda b, t: (0, 0)),
            pl.BlockSpec((16, 1), lambda b, t: (0, 0)),
            pl.BlockSpec((8, 16), lambda b, t: (0, 0)),
            pl.BlockSpec((8, 1), lambda b, t: (0, 0)),
            pl.BlockSpec((8, 1), lambda b, t: (0, 0)),
            pl.BlockSpec((1, 1), lambda b, t: (0, 0)),
        ],
        out_specs=pl.BlockSpec((1, 1, nt * P_pad), lambda b, t: (b, 0, t)),
        compiler_params=pltpu.CompilerParams(
            dimension_semantics=("parallel", "parallel"),
            vmem_limit_bytes=vmem_limit),
    )(sampled, ref, w0e, b0, w1f, b1, wsc, bs)

    out = out.reshape(B, N, P_pad)
    if P_pad != P:
        out = out[:, :, :P]
    return out.reshape(B, N, H, W)


# ----------------------------------------------------------------------------
# Parameter construction (deterministic; BatchNorm given as scale/shift pairs)
# ----------------------------------------------------------------------------
def make_params(key, group_size):
    eps = 1e-5
    ks = jax.random.split(key, 12)

    def bn_fold(gamma, beta, mean, var):
        scale = gamma / jnp.sqrt(var + eps)
        shift = beta - mean * scale
        return scale[:, None], shift[:, None]

    # conv0: Conv3d(G -> 16, k=1, bias=False) + BN
    w0 = 0.2 * jax.random.normal(ks[0], (16, group_size), jnp.float32)
    s0, b0 = bn_fold(jax.random.uniform(ks[1], (16,), jnp.float32, 0.8, 1.2),
                     0.05 * jax.random.normal(ks[2], (16,), jnp.float32),
                     0.05 * jax.random.normal(ks[3], (16,), jnp.float32),
                     jax.random.uniform(ks[4], (16,), jnp.float32, 0.5, 1.5))
    # conv1: Conv3d(16 -> 8, k=1, bias=False) + BN
    w1 = 0.2 * jax.random.normal(ks[5], (8, 16), jnp.float32)
    s1, b1 = bn_fold(jax.random.uniform(ks[6], (8,), jnp.float32, 0.8, 1.2),
                     0.05 * jax.random.normal(ks[7], (8,), jnp.float32),
                     0.05 * jax.random.normal(ks[8], (8,), jnp.float32),
                     jax.random.uniform(ks[9], (8,), jnp.float32, 0.5, 1.5))
    # similarity / conv2: Conv3d(8 -> 1, k=1) with bias
    ws = 0.2 * jax.random.normal(ks[10], (1, 8), jnp.float32)
    bs = 0.05 * jax.random.normal(ks[11], (1, 1), jnp.float32)
    return (w0, s0, b0, w1, s1, b1, ws, bs)


# ----------------------------------------------------------------------------
# Pure-JAX f32 reference for verification (unfolded params, PyTorch semantics)
# ----------------------------------------------------------------------------
def reference(ref_feature, grid, params, neighbors, group_size):
    B, C, H, W = ref_feature.shape
    G, Cg, N, P = group_size, C // group_size, neighbors, H * W
    w0, s0, b0, w1, s1, b1, ws, bs = params

    sampled = grid_sample_bilinear_border(ref_feature, grid)
    sampled = sampled.reshape(B, G, Cg, N, H, W)
    rf = ref_feature.reshape(B, G, Cg, 1, H, W)
    corr = jnp.mean(sampled * rf, axis=2)                          # (B, G, N, H, W)
    x = corr.reshape(B, G, N * P)
    h0 = jnp.maximum(jnp.einsum('oc,bcp->bop', w0, x) * s0 + b0, 0.0)
    h1 = jnp.maximum(jnp.einsum('oc,bcp->bop', w1, h0) * s1 + b1, 0.0)
    sim = jnp.einsum('oc,bcp->bop', ws, h1) + bs
    return jax.nn.sigmoid(sim).reshape(B, N, H, W)


if __name__ == "__main__":
    # Small, module-consistent shapes
    B, C, H, W = 2, 32, 16, 16
    neighbors, group_size = 9, 4

    key = jax.random.PRNGKey(0)
    k_feat, k_grid, k_par = jax.random.split(key, 3)

    ref_feature = jax.random.normal(k_feat, (B, C, H, W), jnp.float32)
    # normalized sampling grid in [-1.1, 1.1] to exercise border clamping
    grid = jax.random.uniform(k_grid, (B, neighbors * H, W, 2), jnp.float32,
                              minval=-1.1, maxval=1.1)
    params = make_params(k_par, group_size)

    out = feature_weight_net(ref_feature, grid, params, neighbors, group_size)
    out = jax.block_until_ready(out)

    ref_out = reference(ref_feature, grid, params, neighbors, group_size)
    assert out.shape == (B, neighbors, H, W)
    # bf16 streamed operands / bf16 MXU feed -> loose-ish tolerance vs pure f32
    assert jnp.allclose(out, ref_out, atol=1e-2, rtol=1e-2), \
        float(jnp.max(jnp.abs(out - ref_out)))

    print("KERNEL_OK")
</pallas_src>

<mosaic_0001>
module attributes {stable_mosaic.version = 11 : i64} {
  func.func @featureweight_kernel(%arg0: i32, %arg1: i32, %arg2: memref<1x32x2304xbf16, #tpu.memory_space<vmem>>, %arg3: memref<1x32x256xbf16, #tpu.memory_space<vmem>>, %arg4: memref<16x32xbf16, #tpu.memory_space<vmem>>, %arg5: memref<16x1xf32, #tpu.memory_space<vmem>>, %arg6: memref<8x16xbf16, #tpu.memory_space<vmem>>, %arg7: memref<8x1xf32, #tpu.memory_space<vmem>>, %arg8: memref<8x1xf32, #tpu.memory_space<vmem>>, %arg9: memref<1x1xf32, #tpu.memory_space<vmem>>, %arg10: memref<1x1x2304xf32, #tpu.memory_space<vmem>>) attributes {dimension_semantics = [#tpu.dimension_semantics<parallel>, #tpu.dimension_semantics<parallel>], iteration_bounds = array<i64: 2, 1>, scalar_prefetch = 0 : i64, scratch_operands = 0 : i64, tpu.core_type = #tpu.core_type<tc>, window_params = [{transform_indices = @transform_0, window_bounds = array<i64: 1, 32, 2304>}, {transform_indices = @transform_1, window_bounds = array<i64: 1, 32, 256>}, {pipeline_mode = #tpu.pipeline_mode<synchronous>, transform_indices = @transform_2, window_bounds = array<i64: 16, 32>}, {pipeline_mode = #tpu.pipeline_mode<synchronous>, transform_indices = @transform_3, window_bounds = array<i64: 16, 1>}, {pipeline_mode = #tpu.pipeline_mode<synchronous>, transform_indices = @transform_4, window_bounds = array<i64: 8, 16>}, {pipeline_mode = #tpu.pipeline_mode<synchronous>, transform_indices = @transform_5, window_bounds = array<i64: 8, 1>}, {pipeline_mode = #tpu.pipeline_mode<synchronous>, transform_indices = @transform_6, window_bounds = array<i64: 8, 1>}, {pipeline_mode = #tpu.pipeline_mode<synchronous>, transform_indices = @transform_7, window_bounds = array<i64: 1, 1>}, {transform_indices = @transform_8, window_bounds = array<i64: 1, 1, 2304>}]} {
    %c0 = arith.constant 0 : index
    %c0_0 = arith.constant 0 : index
    %c0_1 = arith.constant 0 : index
    %0 = vector.load %arg3[%c0, %c0_0, %c0_1] : memref<1x32x256xbf16, #tpu.memory_space<vmem>>, vector<1x32x256xbf16>
    %1 = vector.shape_cast %0 : vector<1x32x256xbf16> to vector<32x256xbf16>
    %c0_2 = arith.constant 0 : index
    %c0_3 = arith.constant 0 : index
    %2 = vector.load %arg4[%c0_2, %c0_3] : memref<16x32xbf16, #tpu.memory_space<vmem>>, vector<16x32xbf16>
    %c0_4 = arith.constant 0 : index
    %c0_5 = arith.constant 0 : index
    %3 = vector.load %arg6[%c0_4, %c0_5] : memref<8x16xbf16, #tpu.memory_space<vmem>>, vector<8x16xbf16>
    %c0_6 = arith.constant 0 : index
    %c0_7 = arith.constant 0 : index
    %4 = vector.load %arg5[%c0_6, %c0_7] : memref<16x1xf32, #tpu.memory_space<vmem>>, vector<16x1xf32>
    %c0_8 = arith.constant 0 : index
    %c0_9 = arith.constant 0 : index
    %5 = vector.load %arg7[%c0_8, %c0_9] : memref<8x1xf32, #tpu.memory_space<vmem>>, vector<8x1xf32>
    %c0_10 = arith.constant 0 : index
    %c0_11 = arith.constant 0 : index
    %6 = vector.load %arg8[%c0_10, %c0_11] : memref<8x1xf32, #tpu.memory_space<vmem>>, vector<8x1xf32>
    %c0_12 = arith.constant 0 : index
    %c0_13 = arith.constant 0 : index
    %7 = vector.load %arg9[%c0_12, %c0_13] : memref<1x1xf32, #tpu.memory_space<vmem>>, vector<1x1xf32>
    %c0_14 = arith.constant 0 : index
    %c0_15 = arith.constant 0 : index
    %c0_16 = arith.constant 0 : index
    %8 = vector.load %arg2[%c0_14, %c0_15, %c0_16] : memref<1x32x2304xbf16, #tpu.memory_space<vmem>>, vector<1x32x256xbf16>
    %9 = vector.shape_cast %8 : vector<1x32x256xbf16> to vector<32x256xbf16>
    %10 = arith.mulf %9, %1 : vector<32x256xbf16>
    %cst = arith.constant dense<0.000000e+00> : vector<16x256xf32>
    %11 = tpu.matmul %2, %10, %cst {dimension_numbers = #tpu.dot_dimension_numbers<[1], [0], [0], [1], [0, 0, 1, 1], [], []>} : vector<16x32xbf16>, vector<32x256xbf16>, vector<16x256xf32> -> vector<16x256xf32>
    %12 = vector.broadcast %4 : vector<16x1xf32> to vector<16x256xf32>
    %13 = arith.addf %11, %12 : vector<16x256xf32>
    %cst_17 = arith.constant 0.000000e+00 : f32
    %14 = vector.broadcast %cst_17 : f32 to vector<16x256xf32>
    %15 = arith.maximumf %13, %14 : vector<16x256xf32>
    %16 = arith.truncf %15 : vector<16x256xf32> to vector<16x256xbf16>
    %cst_18 = arith.constant dense<0.000000e+00> : vector<8x256xf32>
    %17 = tpu.matmul %3, %16, %cst_18 {dimension_numbers = #tpu.dot_dimension_numbers<[1], [0], [0], [1], [0, 0, 1, 1], [], []>} : vector<8x16xbf16>, vector<16x256xbf16>, vector<8x256xf32> -> vector<8x256xf32>
    %18 = vector.broadcast %5 : vector<8x1xf32> to vector<8x256xf32>
    %19 = arith.addf %17, %18 : vector<8x256xf32>
    %cst_19 = arith.constant 0.000000e+00 : f32
    %20 = vector.broadcast %cst_19 : f32 to vector<8x256xf32>
    %21 = arith.maximumf %19, %20 : vector<8x256xf32>
    %22 = vector.broadcast %6 : vector<8x1xf32> to vector<8x256xf32>
    %23 = arith.mulf %21, %22 : vector<8x256xf32>
    %cst_20 = arith.constant dense<0.000000e+00> : vector<256xf32>
    %24 = vector.multi_reduction <add>, %23, %cst_20 [0] : vector<8x256xf32> to vector<256xf32>
    %25 = vector.shape_cast %24 : vector<256xf32> to vector<1x256xf32>
    %26 = vector.broadcast %7 : vector<1x1xf32> to vector<1x256xf32>
    %27 = arith.addf %25, %26 : vector<1x256xf32>
    %28 = arith.negf %27 : vector<1x256xf32>
    %29 = math.exp %28 : vector<1x256xf32>
    %cst_21 = arith.constant 1.000000e+00 : f32
    %30 = vector.broadcast %cst_21 : f32 to vector<1x256xf32>
    %31 = arith.addf %30, %29 : vector<1x256xf32>
    %32 = arith.divf %30, %31 : vector<1x256xf32>
    %c0_22 = arith.constant 0 : index
    %c0_23 = arith.constant 0 : index
    %c0_24 = arith.constant 0 : index
    %33 = vector.load %arg10[%c0_22, %c0_23, %c0_24] : memref<1x1x2304xf32, #tpu.memory_space<vmem>>, vector<1x1x256xf32>
    %34 = vector.shape_cast %33 : vector<1x1x256xf32> to vector<1x256xf32>
    %35 = vector.shape_cast %32 : vector<1x256xf32> to vector<1x1x256xf32>
    tpu.vector_store %arg10[%c0_22, %c0_23, %c0_24], %35 {strides = array<i32>} : memref<1x1x2304xf32, #tpu.memory_space<vmem>>, vector<1x1x256xf32>,
    %c0_25 = arith.constant 0 : index
    %c0_26 = arith.constant 0 : index
    %c256 = arith.constant 256 : index
    %36 = vector.load %arg2[%c0_25, %c0_26, %c256] : memref<1x32x2304xbf16, #tpu.memory_space<vmem>>, vector<1x32x256xbf16>
    %37 = vector.shape_cast %36 : vector<1x32x256xbf16> to vector<32x256xbf16>
    %38 = arith.mulf %37, %1 : vector<32x256xbf16>
    %cst_27 = arith.constant dense<0.000000e+00> : vector<16x256xf32>
    %39 = tpu.matmul %2, %38, %cst_27 {dimension_numbers = #tpu.dot_dimension_numbers<[1], [0], [0], [1], [0, 0, 1, 1], [], []>} : vector<16x32xbf16>, vector<32x256xbf16>, vector<16x256xf32> -> vector<16x256xf32>
    %40 = vector.broadcast %4 : vector<16x1xf32> to vector<16x256xf32>
    %41 = arith.addf %39, %40 : vector<16x256xf32>
    %cst_28 = arith.constant 0.000000e+00 : f32
    %42 = vector.broadcast %cst_28 : f32 to vector<16x256xf32>
    %43 = arith.maximumf %41, %42 : vector<16x256xf32>
    %44 = arith.truncf %43 : vector<16x256xf32> to vector<16x256xbf16>
    %cst_29 = arith.constant dense<0.000000e+00> : vector<8x256xf32>
    %45 = tpu.matmul %3, %44, %cst_29 {dimension_numbers = #tpu.dot_dimension_numbers<[1], [0], [0], [1], [0, 0, 1, 1], [], []>} : vector<8x16xbf16>, vector<16x256xbf16>, vector<8x256xf32> -> vector<8x256xf32>
    %46 = vector.broadcast %5 : vector<8x1xf32> to vector<8x256xf32>
    %47 = arith.addf %45, %46 : vector<8x256xf32>
    %cst_30 = arith.constant 0.000000e+00 : f32
    %48 = vector.broadcast %cst_30 : f32 to vector<8x256xf32>
    %49 = arith.maximumf %47, %48 : vector<8x256xf32>
    %50 = vector.broadcast %6 : vector<8x1xf32> to vector<8x256xf32>
    %51 = arith.mulf %49, %50 : vector<8x256xf32>
    %cst_31 = arith.constant dense<0.000000e+00> : vector<256xf32>
    %52 = vector.multi_reduction <add>, %51, %cst_31 [0] : vector<8x256xf32> to vector<256xf32>
    %53 = vector.shape_cast %52 : vector<256xf32> to vector<1x256xf32>
    %54 = vector.broadcast %7 : vector<1x1xf32> to vector<1x256xf32>
    %55 = arith.addf %53, %54 : vector<1x256xf32>
    %56 = arith.negf %55 : vector<1x256xf32>
    %57 = math.exp %56 : vector<1x256xf32>
    %cst_32 = arith.constant 1.000000e+00 : f32
    %58 = vector.broadcast %cst_32 : f32 to vector<1x256xf32>
    %59 = arith.addf %58, %57 : vector<1x256xf32>
    %60 = arith.divf %58, %59 : vector<1x256xf32>
    %c0_33 = arith.constant 0 : index
    %c0_34 = arith.constant 0 : index
    %c256_35 = arith.constant 256 : index
    %61 = vector.load %arg10[%c0_33, %c0_34, %c256_35] : memref<1x1x2304xf32, #tpu.memory_space<vmem>>, vector<1x1x256xf32>
    %62 = vector.shape_cast %61 : vector<1x1x256xf32> to vector<1x256xf32>
    %63 = vector.shape_cast %60 : vector<1x256xf32> to vector<1x1x256xf32>
    tpu.vector_store %arg10[%c0_33, %c0_34, %c256_35], %63 {strides = array<i32>} : memref<1x1x2304xf32, #tpu.memory_space<vmem>>, vector<1x1x256xf32>,
    %c0_36 = arith.constant 0 : index
    %c0_37 = arith.constant 0 : index
    %c512 = arith.constant 512 : index
    %64 = vector.load %arg2[%c0_36, %c0_37, %c512] : memref<1x32x2304xbf16, #tpu.memory_space<vmem>>, vector<1x32x256xbf16>
    %65 = vector.shape_cast %64 : vector<1x32x256xbf16> to vector<32x256xbf16>
    %66 = arith.mulf %65, %1 : vector<32x256xbf16>
    %cst_38 = arith.constant dense<0.000000e+00> : vector<16x256xf32>
    %67 = tpu.matmul %2, %66, %cst_38 {dimension_numbers = #tpu.dot_dimension_numbers<[1], [0], [0], [1], [0, 0, 1, 1], [], []>} : vector<16x32xbf16>, vector<32x256xbf16>, vector<16x256xf32> -> vector<16x256xf32>
    %68 = vector.broadcast %4 : vector<16x1xf32> to vector<16x256xf32>
    %69 = arith.addf %67, %68 : vector<16x256xf32>
    %cst_39 = arith.constant 0.000000e+00 : f32
    %70 = vector.broadcast %cst_39 : f32 to vector<16x256xf32>
    %71 = arith.maximumf %69, %70 : vector<16x256xf32>
    %72 = arith.truncf %71 : vector<16x256xf32> to vector<16x256xbf16>
    %cst_40 = arith.constant dense<0.000000e+00> : vector<8x256xf32>
    %73 = tpu.matmul %3, %72, %cst_40 {dimension_numbers = #tpu.dot_dimension_numbers<[1], [0], [0], [1], [0, 0, 1, 1], [], []>} : vector<8x16xbf16>, vector<16x256xbf16>, vector<8x256xf32> -> vector<8x256xf32>
    %74 = vector.broadcast %5 : vector<8x1xf32> to vector<8x256xf32>
    %75 = arith.addf %73, %74 : vector<8x256xf32>
    %cst_41 = arith.constant 0.000000e+00 : f32
    %76 = vector.broadcast %cst_41 : f32 to vector<8x256xf32>
    %77 = arith.maximumf %75, %76 : vector<8x256xf32>
    %78 = vector.broadcast %6 : vector<8x1xf32> to vector<8x256xf32>
    %79 = arith.mulf %77, %78 : vector<8x256xf32>
    %cst_42 = arith.constant dense<0.000000e+00> : vector<256xf32>
    %80 = vector.multi_reduction <add>, %79, %cst_42 [0] : vector<8x256xf32> to vector<256xf32>
    %81 = vector.shape_cast %80 : vector<256xf32> to vector<1x256xf32>
    %82 = vector.broadcast %7 : vector<1x1xf32> to vector<1x256xf32>
    %83 = arith.addf %81, %82 : vector<1x256xf32>
    %84 = arith.negf %83 : vector<1x256xf32>
    %85 = math.exp %84 : vector<1x256xf32>
    %cst_43 = arith.constant 1.000000e+00 : f32
    %86 = vector.broadcast %cst_43 : f32 to vector<1x256xf32>
    %87 = arith.addf %86, %85 : vector<1x256xf32>
    %88 = arith.divf %86, %87 : vector<1x256xf32>
    %c0_44 = arith.constant 0 : index
    %c0_45 = arith.constant 0 : index
    %c512_46 = arith.constant 512 : index
    %89 = vector.load %arg10[%c0_44, %c0_45, %c512_46] : memref<1x1x2304xf32, #tpu.memory_space<vmem>>, vector<1x1x256xf32>
    %90 = vector.shape_cast %89 : vector<1x1x256xf32> to vector<1x256xf32>
    %91 = vector.shape_cast %88 : vector<1x256xf32> to vector<1x1x256xf32>
    tpu.vector_store %arg10[%c0_44, %c0_45, %c512_46], %91 {strides = array<i32>} : memref<1x1x2304xf32, #tpu.memory_space<vmem>>, vector<1x1x256xf32>,
    %c0_47 = arith.constant 0 : index
    %c0_48 = arith.constant 0 : index
    %c768 = arith.constant 768 : index
    %92 = vector.load %arg2[%c0_47, %c0_48, %c768] : memref<1x32x2304xbf16, #tpu.memory_space<vmem>>, vector<1x32x256xbf16>
    %93 = vector.shape_cast %92 : vector<1x32x256xbf16> to vector<32x256xbf16>
    %94 = arith.mulf %93, %1 : vector<32x256xbf16>
    %cst_49 = arith.constant dense<0.000000e+00> : vector<16x256xf32>
    %95 = tpu.matmul %2, %94, %cst_49 {dimension_numbers = #tpu.dot_dimension_numbers<[1], [0], [0], [1], [0, 0, 1, 1], [], []>} : vector<16x32xbf16>, vector<32x256xbf16>, vector<16x256xf32> -> vector<16x256xf32>
    %96 = vector.broadcast %4 : vector<16x1xf32> to vector<16x256xf32>
    %97 = arith.addf %95, %96 : vector<16x256xf32>
    %cst_50 = arith.constant 0.000000e+00 : f32
    %98 = vector.broadcast %cst_50 : f32 to vector<16x256xf32>
    %99 = arith.maximumf %97, %98 : vector<16x256xf32>
    %100 = arith.truncf %99 : vector<16x256xf32> to vector<16x256xbf16>
    %cst_51 = arith.constant dense<0.000000e+00> : vector<8x256xf32>
    %101 = tpu.matmul %3, %100, %cst_51 {dimension_numbers = #tpu.dot_dimension_numbers<[1], [0], [0], [1], [0, 0, 1, 1], [], []>} : vector<8x16xbf16>, vector<16x256xbf16>, vector<8x256xf32> -> vector<8x256xf32>
    %102 = vector.broadcast %5 : vector<8x1xf32> to vector<8x256xf32>
    %103 = arith.addf %101, %102 : vector<8x256xf32>
    %cst_52 = arith.constant 0.000000e+00 : f32
    %104 = vector.broadcast %cst_52 : f32 to vector<8x256xf32>
    %105 = arith.maximumf %103, %104 : vector<8x256xf32>
    %106 = vector.broadcast %6 : vector<8x1xf32> to vector<8x256xf32>
    %107 = arith.mulf %105, %106 : vector<8x256xf32>
    %cst_53 = arith.constant dense<0.000000e+00> : vector<256xf32>
    %108 = vector.multi_reduction <add>, %107, %cst_53 [0] : vector<8x256xf32> to vector<256xf32>
    %109 = vector.shape_cast %108 : vector<256xf32> to vector<1x256xf32>
    %110 = vector.broadcast %7 : vector<1x1xf32> to vector<1x256xf32>
    %111 = arith.addf %109, %110 : vector<1x256xf32>
    %112 = arith.negf %111 : vector<1x256xf32>
    %113 = math.exp %112 : vector<1x256xf32>
    %cst_54 = arith.constant 1.000000e+00 : f32
    %114 = vector.broadcast %cst_54 : f32 to vector<1x256xf32>
    %115 = arith.addf %114, %113 : vector<1x256xf32>
    %116 = arith.divf %114, %115 : vector<1x256xf32>
    %c0_55 = arith.constant 0 : index
    %c0_56 = arith.constant 0 : index
    %c768_57 = arith.constant 768 : index
    %117 = vector.load %arg10[%c0_55, %c0_56, %c768_57] : memref<1x1x2304xf32, #tpu.memory_space<vmem>>, vector<1x1x256xf32>
    %118 = vector.shape_cast %117 : vector<1x1x256xf32> to vector<1x256xf32>
    %119 = vector.shape_cast %116 : vector<1x256xf32> to vector<1x1x256xf32>
    tpu.vector_store %arg10[%c0_55, %c0_56, %c768_57], %119 {strides = array<i32>} : memref<1x1x2304xf32, #tpu.memory_space<vmem>>, vector<1x1x256xf32>,
    %c0_58 = arith.constant 0 : index
    %c0_59 = arith.constant 0 : index
    %c1024 = arith.constant 1024 : index
    %120 = vector.load %arg2[%c0_58, %c0_59, %c1024] : memref<1x32x2304xbf16, #tpu.memory_space<vmem>>, vector<1x32x256xbf16>
    %121 = vector.shape_cast %120 : vector<1x32x256xbf16> to vector<32x256xbf16>
    %122 = arith.mulf %121, %1 : vector<32x256xbf16>
    %cst_60 = arith.constant dense<0.000000e+00> : vector<16x256xf32>
    %123 = tpu.matmul %2, %122, %cst_60 {dimension_numbers = #tpu.dot_dimension_numbers<[1], [0], [0], [1], [0, 0, 1, 1], [], []>} : vector<16x32xbf16>, vector<32x256xbf16>, vector<16x256xf32> -> vector<16x256xf32>
    %124 = vector.broadcast %4 : vector<16x1xf32> to vector<16x256xf32>
    %125 = arith.addf %123, %124 : vector<16x256xf32>
    %cst_61 = arith.constant 0.000000e+00 : f32
    %126 = vector.broadcast %cst_61 : f32 to vector<16x256xf32>
    %127 = arith.maximumf %125, %126 : vector<16x256xf32>
    %128 = arith.truncf %127 : vector<16x256xf32> to vector<16x256xbf16>
    %cst_62 = arith.constant dense<0.000000e+00> : vector<8x256xf32>
    %129 = tpu.matmul %3, %128, %cst_62 {dimension_numbers = #tpu.dot_dimension_numbers<[1], [0], [0], [1], [0, 0, 1, 1], [], []>} : vector<8x16xbf16>, vector<16x256xbf16>, vector<8x256xf32> -> vector<8x256xf32>
    %130 = vector.broadcast %5 : vector<8x1xf32> to vector<8x256xf32>
    %131 = arith.addf %129, %130 : vector<8x256xf32>
    %cst_63 = arith.constant 0.000000e+00 : f32
    %132 = vector.broadcast %cst_63 : f32 to vector<8x256xf32>
    %133 = arith.maximumf %131, %132 : vector<8x256xf32>
    %134 = vector.broadcast %6 : vector<8x1xf32> to vector<8x256xf32>
    %135 = arith.mulf %133, %134 : vector<8x256xf32>
    %cst_64 = arith.constant dense<0.000000e+00> : vector<256xf32>
    %136 = vector.multi_reduction <add>, %135, %cst_64 [0] : vector<8x256xf32> to vector<256xf32>
    %137 = vector.shape_cast %136 : vector<256xf32> to vector<1x256xf32>
    %138 = vector.broadcast %7 : vector<1x1xf32> to vector<1x256xf32>
    %139 = arith.addf %137, %138 : vector<1x256xf32>
    %140 = arith.negf %139 : vector<1x256xf32>
    %141 = math.exp %140 : vector<1x256xf32>
    %cst_65 = arith.constant 1.000000e+00 : f32
    %142 = vector.broadcast %cst_65 : f32 to vector<1x256xf32>
    %143 = arith.addf %142, %141 : vector<1x256xf32>
    %144 = arith.divf %142, %143 : vector<1x256xf32>
    %c0_66 = arith.constant 0 : index
    %c0_67 = arith.constant 0 : index
    %c1024_68 = arith.constant 1024 : index
    %145 = vector.load %arg10[%c0_66, %c0_67, %c1024_68] : memref<1x1x2304xf32, #tpu.memory_space<vmem>>, vector<1x1x256xf32>
    %146 = vector.shape_cast %145 : vector<1x1x256xf32> to vector<1x256xf32>
    %147 = vector.shape_cast %144 : vector<1x256xf32> to vector<1x1x256xf32>
    tpu.vector_store %arg10[%c0_66, %c0_67, %c1024_68], %147 {strides = array<i32>} : memref<1x1x2304xf32, #tpu.memory_space<vmem>>, vector<1x1x256xf32>,
    %c0_69 = arith.constant 0 : index
    %c0_70 = arith.constant 0 : index
    %c1280 = arith.constant 1280 : index
    %148 = vector.load %arg2[%c0_69, %c0_70, %c1280] : memref<1x32x2304xbf16, #tpu.memory_space<vmem>>, vector<1x32x256xbf16>
    %149 = vector.shape_cast %148 : vector<1x32x256xbf16> to vector<32x256xbf16>
    %150 = arith.mulf %149, %1 : vector<32x256xbf16>
    %cst_71 = arith.constant dense<0.000000e+00> : vector<16x256xf32>
    %151 = tpu.matmul %2, %150, %cst_71 {dimension_numbers = #tpu.dot_dimension_numbers<[1], [0], [0], [1], [0, 0, 1, 1], [], []>} : vector<16x32xbf16>, vector<32x256xbf16>, vector<16x256xf32> -> vector<16x256xf32>
    %152 = vector.broadcast %4 : vector<16x1xf32> to vector<16x256xf32>
    %153 = arith.addf %151, %152 : vector<16x256xf32>
    %cst_72 = arith.constant 0.000000e+00 : f32
    %154 = vector.broadcast %cst_72 : f32 to vector<16x256xf32>
    %155 = arith.maximumf %153, %154 : vector<16x256xf32>
    %156 = arith.truncf %155 : vector<16x256xf32> to vector<16x256xbf16>
    %cst_73 = arith.constant dense<0.000000e+00> : vector<8x256xf32>
    %157 = tpu.matmul %3, %156, %cst_73 {dimension_numbers = #tpu.dot_dimension_numbers<[1], [0], [0], [1], [0, 0, 1, 1], [], []>} : vector<8x16xbf16>, vector<16x256xbf16>, vector<8x256xf32> -> vector<8x256xf32>
    %158 = vector.broadcast %5 : vector<8x1xf32> to vector<8x256xf32>
    %159 = arith.addf %157, %158 : vector<8x256xf32>
    %cst_74 = arith.constant 0.000000e+00 : f32
    %160 = vector.broadcast %cst_74 : f32 to vector<8x256xf32>
    %161 = arith.maximumf %159, %160 : vector<8x256xf32>
    %162 = vector.broadcast %6 : vector<8x1xf32> to vector<8x256xf32>
    %163 = arith.mulf %161, %162 : vector<8x256xf32>
    %cst_75 = arith.constant dense<0.000000e+00> : vector<256xf32>
    %164 = vector.multi_reduction <add>, %163, %cst_75 [0] : vector<8x256xf32> to vector<256xf32>
    %165 = vector.shape_cast %164 : vector<256xf32> to vector<1x256xf32>
    %166 = vector.broadcast %7 : vector<1x1xf32> to vector<1x256xf32>
    %167 = arith.addf %165, %166 : vector<1x256xf32>
    %168 = arith.negf %167 : vector<1x256xf32>
    %169 = math.exp %168 : vector<1x256xf32>
    %cst_76 = arith.constant 1.000000e+00 : f32
    %170 = vector.broadcast %cst_76 : f32 to vector<1x256xf32>
    %171 = arith.addf %170, %169 : vector<1x256xf32>
    %172 = arith.divf %170, %171 : vector<1x256xf32>
    %c0_77 = arith.constant 0 : index
    %c0_78 = arith.constant 0 : index
    %c1280_79 = arith.constant 1280 : index
    %173 = vector.load %arg10[%c0_77, %c0_78, %c1280_79] : memref<1x1x2304xf32, #tpu.memory_space<vmem>>, vector<1x1x256xf32>
    %174 = vector.shape_cast %173 : vector<1x1x256xf32> to vector<1x256xf32>
    %175 = vector.shape_cast %172 : vector<1x256xf32> to vector<1x1x256xf32>
    tpu.vector_store %arg10[%c0_77, %c0_78, %c1280_79], %175 {strides = array<i32>} : memref<1x1x2304xf32, #tpu.memory_space<vmem>>, vector<1x1x256xf32>,
    %c0_80 = arith.constant 0 : index
    %c0_81 = arith.constant 0 : index
    %c1536 = arith.constant 1536 : index
    %176 = vector.load %arg2[%c0_80, %c0_81, %c1536] : memref<1x32x2304xbf16, #tpu.memory_space<vmem>>, vector<1x32x256xbf16>
    %177 = vector.shape_cast %176 : vector<1x32x256xbf16> to vector<32x256xbf16>
    %178 = arith.mulf %177, %1 : vector<32x256xbf16>
    %cst_82 = arith.constant dense<0.000000e+00> : vector<16x256xf32>
    %179 = tpu.matmul %2, %178, %cst_82 {dimension_numbers = #tpu.dot_dimension_numbers<[1], [0], [0], [1], [0, 0, 1, 1], [], []>} : vector<16x32xbf16>, vector<32x256xbf16>, vector<16x256xf32> -> vector<16x256xf32>
    %180 = vector.broadcast %4 : vector<16x1xf32> to vector<16x256xf32>
    %181 = arith.addf %179, %180 : vector<16x256xf32>
    %cst_83 = arith.constant 0.000000e+00 : f32
    %182 = vector.broadcast %cst_83 : f32 to vector<16x256xf32>
    %183 = arith.maximumf %181, %182 : vector<16x256xf32>
    %184 = arith.truncf %183 : vector<16x256xf32> to vector<16x256xbf16>
    %cst_84 = arith.constant dense<0.000000e+00> : vector<8x256xf32>
    %185 = tpu.matmul %3, %184, %cst_84 {dimension_numbers = #tpu.dot_dimension_numbers<[1], [0], [0], [1], [0, 0, 1, 1], [], []>} : vector<8x16xbf16>, vector<16x256xbf16>, vector<8x256xf32> -> vector<8x256xf32>
    %186 = vector.broadcast %5 : vector<8x1xf32> to vector<8x256xf32>
    %187 = arith.addf %185, %186 : vector<8x256xf32>
    %cst_85 = arith.constant 0.000000e+00 : f32
    %188 = vector.broadcast %cst_85 : f32 to vector<8x256xf32>
    %189 = arith.maximumf %187, %188 : vector<8x256xf32>
    %190 = vector.broadcast %6 : vector<8x1xf32> to vector<8x256xf32>
    %191 = arith.mulf %189, %190 : vector<8x256xf32>
    %cst_86 = arith.constant dense<0.000000e+00> : vector<256xf32>
    %192 = vector.multi_reduction <add>, %191, %cst_86 [0] : vector<8x256xf32> to vector<256xf32>
    %193 = vector.shape_cast %192 : vector<256xf32> to vector<1x256xf32>
    %194 = vector.broadcast %7 : vector<1x1xf32> to vector<1x256xf32>
    %195 = arith.addf %193, %194 : vector<1x256xf32>
    %196 = arith.negf %195 : vector<1x256xf32>
    %197 = math.exp %196 : vector<1x256xf32>
    %cst_87 = arith.constant 1.000000e+00 : f32
    %198 = vector.broadcast %cst_87 : f32 to vector<1x256xf32>
    %199 = arith.addf %198, %197 : vector<1x256xf32>
    %200 = arith.divf %198, %199 : vector<1x256xf32>
    %c0_88 = arith.constant 0 : index
    %c0_89 = arith.constant 0 : index
    %c1536_90 = arith.constant 1536 : index
    %201 = vector.load %arg10[%c0_88, %c0_89, %c1536_90] : memref<1x1x2304xf32, #tpu.memory_space<vmem>>, vector<1x1x256xf32>
    %202 = vector.shape_cast %201 : vector<1x1x256xf32> to vector<1x256xf32>
    %203 = vector.shape_cast %200 : vector<1x256xf32> to vector<1x1x256xf32>
    tpu.vector_store %arg10[%c0_88, %c0_89, %c1536_90], %203 {strides = array<i32>} : memref<1x1x2304xf32, #tpu.memory_space<vmem>>, vector<1x1x256xf32>,
    %c0_91 = arith.constant 0 : index
    %c0_92 = arith.constant 0 : index
    %c1792 = arith.constant 1792 : index
    %204 = vector.load %arg2[%c0_91, %c0_92, %c1792] : memref<1x32x2304xbf16, #tpu.memory_space<vmem>>, vector<1x32x256xbf16>
    %205 = vector.shape_cast %204 : vector<1x32x256xbf16> to vector<32x256xbf16>
    %206 = arith.mulf %205, %1 : vector<32x256xbf16>
    %cst_93 = arith.constant dense<0.000000e+00> : vector<16x256xf32>
    %207 = tpu.matmul %2, %206, %cst_93 {dimension_numbers = #tpu.dot_dimension_numbers<[1], [0], [0], [1], [0, 0, 1, 1], [], []>} : vector<16x32xbf16>, vector<32x256xbf16>, vector<16x256xf32> -> vector<16x256xf32>
    %208 = vector.broadcast %4 : vector<16x1xf32> to vector<16x256xf32>
    %209 = arith.addf %207, %208 : vector<16x256xf32>
    %cst_94 = arith.constant 0.000000e+00 : f32
    %210 = vector.broadcast %cst_94 : f32 to vector<16x256xf32>
    %211 = arith.maximumf %209, %210 : vector<16x256xf32>
    %212 = arith.truncf %211 : vector<16x256xf32> to vector<16x256xbf16>
    %cst_95 = arith.constant dense<0.000000e+00> : vector<8x256xf32>
    %213 = tpu.matmul %3, %212, %cst_95 {dimension_numbers = #tpu.dot_dimension_numbers<[1], [0], [0], [1], [0, 0, 1, 1], [], []>} : vector<8x16xbf16>, vector<16x256xbf16>, vector<8x256xf32> -> vector<8x256xf32>
    %214 = vector.broadcast %5 : vector<8x1xf32> to vector<8x256xf32>
    %215 = arith.addf %213, %214 : vector<8x256xf32>
    %cst_96 = arith.constant 0.000000e+00 : f32
    %216 = vector.broadcast %cst_96 : f32 to vector<8x256xf32>
    %217 = arith.maximumf %215, %216 : vector<8x256xf32>
    %218 = vector.broadcast %6 : vector<8x1xf32> to vector<8x256xf32>
    %219 = arith.mulf %217, %218 : vector<8x256xf32>
    %cst_97 = arith.constant dense<0.000000e+00> : vector<256xf32>
    %220 = vector.multi_reduction <add>, %219, %cst_97 [0] : vector<8x256xf32> to vector<256xf32>
    %221 = vector.shape_cast %220 : vector<256xf32> to vector<1x256xf32>
    %222 = vector.broadcast %7 : vector<1x1xf32> to vector<1x256xf32>
    %223 = arith.addf %221, %222 : vector<1x256xf32>
    %224 = arith.negf %223 : vector<1x256xf32>
    %225 = math.exp %224 : vector<1x256xf32>
    %cst_98 = arith.constant 1.000000e+00 : f32
    %226 = vector.broadcast %cst_98 : f32 to vector<1x256xf32>
    %227 = arith.addf %226, %225 : vector<1x256xf32>
    %228 = arith.divf %226, %227 : vector<1x256xf32>
    %c0_99 = arith.constant 0 : index
    %c0_100 = arith.constant 0 : index
    %c1792_101 = arith.constant 1792 : index
    %229 = vector.load %arg10[%c0_99, %c0_100, %c1792_101] : memref<1x1x2304xf32, #tpu.memory_space<vmem>>, vector<1x1x256xf32>
    %230 = vector.shape_cast %229 : vector<1x1x256xf32> to vector<1x256xf32>
    %231 = vector.shape_cast %228 : vector<1x256xf32> to vector<1x1x256xf32>
    tpu.vector_store %arg10[%c0_99, %c0_100, %c1792_101], %231 {strides = array<i32>} : memref<1x1x2304xf32, #tpu.memory_space<vmem>>, vector<1x1x256xf32>,
    %c0_102 = arith.constant 0 : index
    %c0_103 = arith.constant 0 : index
    %c2048 = arith.constant 2048 : index
    %232 = vector.load %arg2[%c0_102, %c0_103, %c2048] : memref<1x32x2304xbf16, #tpu.memory_space<vmem>>, vector<1x32x256xbf16>
    %233 = vector.shape_cast %232 : vector<1x32x256xbf16> to vector<32x256xbf16>
    %234 = arith.mulf %233, %1 : vector<32x256xbf16>
    %cst_104 = arith.constant dense<0.000000e+00> : vector<16x256xf32>
    %235 = tpu.matmul %2, %234, %cst_104 {dimension_numbers = #tpu.dot_dimension_numbers<[1], [0], [0], [1], [0, 0, 1, 1], [], []>} : vector<16x32xbf16>, vector<32x256xbf16>, vector<16x256xf32> -> vector<16x256xf32>
    %236 = vector.broadcast %4 : vector<16x1xf32> to vector<16x256xf32>
    %237 = arith.addf %235, %236 : vector<16x256xf32>
    %cst_105 = arith.constant 0.000000e+00 : f32
    %238 = vector.broadcast %cst_105 : f32 to vector<16x256xf32>
    %239 = arith.maximumf %237, %238 : vector<16x256xf32>
    %240 = arith.truncf %239 : vector<16x256xf32> to vector<16x256xbf16>
    %cst_106 = arith.constant dense<0.000000e+00> : vector<8x256xf32>
    %241 = tpu.matmul %3, %240, %cst_106 {dimension_numbers = #tpu.dot_dimension_numbers<[1], [0], [0], [1], [0, 0, 1, 1], [], []>} : vector<8x16xbf16>, vector<16x256xbf16>, vector<8x256xf32> -> vector<8x256xf32>
    %242 = vector.broadcast %5 : vector<8x1xf32> to vector<8x256xf32>
    %243 = arith.addf %241, %242 : vector<8x256xf32>
    %cst_107 = arith.constant 0.000000e+00 : f32
    %244 = vector.broadcast %cst_107 : f32 to vector<8x256xf32>
    %245 = arith.maximumf %243, %244 : vector<8x256xf32>
    %246 = vector.broadcast %6 : vector<8x1xf32> to vector<8x256xf32>
    %247 = arith.mulf %245, %246 : vector<8x256xf32>
    %cst_108 = arith.constant dense<0.000000e+00> : vector<256xf32>
    %248 = vector.multi_reduction <add>, %247, %cst_108 [0] : vector<8x256xf32> to vector<256xf32>
    %249 = vector.shape_cast %248 : vector<256xf32> to vector<1x256xf32>
    %250 = vector.broadcast %7 : vector<1x1xf32> to vector<1x256xf32>
    %251 = arith.addf %249, %250 : vector<1x256xf32>
    %252 = arith.negf %251 : vector<1x256xf32>
    %253 = math.exp %252 : vector<1x256xf32>
    %cst_109 = arith.constant 1.000000e+00 : f32
    %254 = vector.broadcast %cst_109 : f32 to vector<1x256xf32>
    %255 = arith.addf %254, %253 : vector<1x256xf32>
    %256 = arith.divf %254, %255 : vector<1x256xf32>
    %c0_110 = arith.constant 0 : index
    %c0_111 = arith.constant 0 : index
    %c2048_112 = arith.constant 2048 : index
    %257 = vector.load %arg10[%c0_110, %c0_111, %c2048_112] : memref<1x1x2304xf32, #tpu.memory_space<vmem>>, vector<1x1x256xf32>
    %258 = vector.shape_cast %257 : vector<1x1x256xf32> to vector<1x256xf32>
    %259 = vector.shape_cast %256 : vector<1x256xf32> to vector<1x1x256xf32>
    tpu.vector_store %arg10[%c0_110, %c0_111, %c2048_112], %259 {strides = array<i32>} : memref<1x1x2304xf32, #tpu.memory_space<vmem>>, vector<1x1x256xf32>,
    return
  }
  func.func @transform_0(%arg0: i32, %arg1: i32) -> (i32, i32, i32) {
    %c0_i32 = arith.constant 0 : i32
    %c0_i32_0 = arith.constant 0 : i32
    return %arg0, %c0_i32, %arg1 : i32, i32, i32
  }
  func.func @transform_1(%arg0: i32, %arg1: i32) -> (i32, i32, i32) {
    %c0_i32 = arith.constant 0 : i32
    %c0_i32_0 = arith.constant 0 : i32
    %c0_i32_1 = arith.constant 0 : i32
    return %arg0, %c0_i32, %c0_i32_0 : i32, i32, i32
  }
  func.func @transform_2(%arg0: i32, %arg1: i32) -> (i32, i32) {
    %c0_i32 = arith.constant 0 : i32
    %c0_i32_0 = arith.constant 0 : i32
    %c0_i32_1 = arith.constant 0 : i32
    return %c0_i32, %c0_i32_0 : i32, i32
  }
  func.func @transform_3(%arg0: i32, %arg1: i32) -> (i32, i32) {
    %c0_i32 = arith.constant 0 : i32
    %c0_i32_0 = arith.constant 0 : i32
    %c0_i32_1 = arith.constant 0 : i32
    return %c0_i32, %c0_i32_0 : i32, i32
  }
  func.func @transform_4(%arg0: i32, %arg1: i32) -> (i32, i32) {
    %c0_i32 = arith.constant 0 : i32
    %c0_i32_0 = arith.constant 0 : i32
    %c0_i32_1 = arith.constant 0 : i32
    return %c0_i32, %c0_i32_0 : i32, i32
  }
  func.func @transform_5(%arg0: i32, %arg1: i32) -> (i32, i32) {
    %c0_i32 = arith.constant 0 : i32
    %c0_i32_0 = arith.constant 0 : i32
    %c0_i32_1 = arith.constant 0 : i32
    return %c0_i32, %c0_i32_0 : i32, i32
  }
  func.func @transform_6(%arg0: i32, %arg1: i32) -> (i32, i32) {
    %c0_i32 = arith.constant 0 : i32
    %c0_i32_0 = arith.constant 0 : i32
    %c0_i32_1 = arith.constant 0 : i32
    return %c0_i32, %c0_i32_0 : i32, i32
  }
  func.func @transform_7(%arg0: i32, %arg1: i32) -> (i32, i32) {
    %c0_i32 = arith.constant 0 : i32
    %c0_i32_0 = arith.constant 0 : i32
    %c0_i32_1 = arith.constant 0 : i32
    return %c0_i32, %c0_i32_0 : i32, i32
  }
  func.func @transform_8(%arg0: i32, %arg1: i32) -> (i32, i32, i32) {
    %c0_i32 = arith.constant 0 : i32
    %c0_i32_0 = arith.constant 0 : i32
    return %arg0, %c0_i32, %arg1 : i32, i32, i32
  }
}

</mosaic_0001>

<bundles_post_ra>
// kernel: feature_weight_net.1
= control target key start
LH: loop header
LB: loop body
LE: loop exit
PB: predicated region body
PF: predicated region fallthrough
CT: control target
= control target key end

     0   :  { %s2281_s29 = smov 0   ;;  %s2283_s30 = smov 0   ;;  %s2641_s0 = inlined_call_operand.vmem [shape: bf16[2,32,2304], index: 0, kind: input, shape index: {}]   ;;  %s2642_s1 = inlined_call_operand.vmem [shape: bf16[2,32,256], index: 1, kind: input, shape index: {}]   ;;  %s2643_s2 = inlined_call_operand.vmem [shape: bf16[16,32], index: 2, kind: input, shape index: {}]   ;;  %s2644_s3 = inlined_call_operand.vmem [shape: f32[16,1], index: 3, kind: input, shape index: {}]   ;;  %s2645_s4 = inlined_call_operand.vmem [shape: bf16[8,16], index: 4, kind: input, shape index: {}]   ;;  %s2646_s5 = inlined_call_operand.vmem [shape: f32[8,1], index: 5, kind: input, shape index: {}]   ;;  %s2647_s6 = inlined_call_operand.vmem [shape: f32[8,1], index: 6, kind: input, shape index: {}]   ;;  %s2648_s7 = inlined_call_operand.<no memory space> [shape: f32[1,1], index: 7, kind: input, shape index: {}]   ;;  %s2649_s8 = inlined_call_operand.vmem [shape: f32[2,1,2304], index: 8, kind: output, shape index: {}]  }
   0x1   :  { %v13_v0 = vstv %s2648_s7  ;;  %s2285_s9 = smov 0  }
   0x2   :  { %14 = vst [vmem:[#allocation2] sm:$0x1] %v13_v0 }
   0x3 LB: > { %s32_s7 = sadd.s32 1, %s2225_s30  ;;  %p2024_p0 = scmp.ge.s32.totalorder %s2229_s9, 1  ;;  %s2229_s9 = sphi %s2285_s9, %s20_s9   ;;  %s2225_s30 = sphi %s2283_s30, %s2653_s30   ;;  %s2221_s29 = sphi %s2281_s29, %s2652_s29  }
   0x4   : > { %p34_p1 = scmp.ge.s32.totalorder %s32_s7, 2  ;;  %p295_p2 = scmp.lt.s32.totalorder %s2229_s9, 3 }
   0x6   : > { %s2655_s7 = smov (%p34_p1, %s32_s7), 0  ;;  %p296_p3 = pnand %p2024_p0, %p295_p2 }
   0x7   : > { %p342_p4 = scmp.lt.s32.totalorder (!%p296_p3), %s2221_s29, 1  ;;  %v2231_v1 = vmov (!%p296_p3), 0   ;;  %v373_v2 = vld [vmem:[%s2644_s3] sm:$0xff] (!%p296_p3)  ;;  %v374_v3 = vld [vmem:[%s2644_s3 + $0x8] sm:$0xff] (!%p296_p3)  ;;  %vm421_vm0 = vcmask (!%p296_p3), 261120   ;;  %vm479_vm1 = vcmask (!%p296_p3), 130048  }
   0x8   : > { %299 = sbr.rel (%p296_p3) target bundleno = 816 (0x330), region = 52  ;;  %457 = vmatprep.mubr.bf16.mxu0 (!%p296_p3), %v2231_v1  ;;  %2132 = vset.pattern.permute.xlu0 (!%p296_p3), %v2231_v1  ;;  %v2340_v21 = vld [vmem:[%s2643_s2] sm:$0xff] (!%p296_p3)  }
   0x9   : > { %388 = vperm.xlu0 (!%p296_p3), %2132, %v373_v2   ;;  %515 = vmatprep.mubr.bf16.mxu1 (!%p296_p3), %v2231_v1  ;;  %v377_v4 = vld [vmem:[#allocation2] sm:$0x1] (!%p296_p3) }
   0xa   : > { %2133 = vset.pattern.permute.xlu1 (!%p296_p3), %v2231_v1  ;;  %v375_v22 = vld [vmem:[%s2646_s5] sm:$0xff] (!%p296_p3) }
   0xb   : > { %476 = vperm.xlu1 (!%p296_p3), %2133, %v375_v22   ;;  %v376_v23 = vld [vmem:[%s2647_s6] sm:$0xff] (!%p296_p3) }
   0xc   : > { %v2372_v51 = vld [vmem:[%s2645_s4] sm:$0xf] (!%p296_p3) }
   0xd   : > { %393 = vperm.xlu0 (!%p296_p3), %2132, %v374_v3  }
   0xf   : > { %s2657_s29 = smov (!%p342_p4, %s2221_s29), 1  ;;  %528 = vperm.xlu1 %2133, %v376_v23  }
  0x10   : > { %s2104_s14 = smul.u32 288, %s2657_s29  ;;  %s2103_s15 = sshll.u32 %s2657_s29, 5 }
  0x11   : > { %s355_s18 = scalar_lea.vmem %s2642_s1, %s2103_s15  ;;  %547 = vperm.xlu0 %2132, %v377_v4   ;;  %s2105_s11 = smul.u32 18, %s2657_s29 }
  0x12   : > { %s2319_s21 = scalar_lea.vmem %s2641_s0, %s2104_s14  ;;  %v2321_v5 = vld [vmem:[%s355_s18] sm:$0xff]  ;;  %v2323_v6 = vld [vmem:[%s355_s18 + $0x8] sm:$0xff]  ;;  %v2325_v7 = vld [vmem:[%s355_s18 + $0x10] sm:$0xff] }
  0x13   : > { %v378_v8 = vld [vmem:[%s2319_s21] sm:$0xff]  ;;  %v379_v9 = vld [vmem:[%s2319_s21 + $0x48] sm:$0xff]  ;;  %v2329_v10 = vld [vmem:[%s355_s18 + $0x18] sm:$0xff]  ;;  %s2512_s14 = scalar_lea.vmem %s2649_s8, %s2105_s11 }
  0x14   : > { %v382_v11 = vmul.bf16 %v378_v8, %v2321_v5  ;;  %v383_v12 = vmul.bf16 %v379_v9, %v2323_v6  ;;  %v380_v13 = vld [vmem:[%s2319_s21 + $0x90] sm:$0xff]  ;;  %v381_v14 = vld [vmem:[%s2319_s21 + $0xd8] sm:$0xff]  ;;  %v591_v28 = vld [vmem:[%s2319_s21 + $0x8] sm:$0xff] }
  0x15   : > { %v384_v15 = vmul.bf16 %v380_v13, %v2325_v7  ;;  %v385_v16 = vmul.bf16 %v381_v14, %v2329_v10  ;;  %v592_v29 = vld [vmem:[%s2319_s21 + $0x50] sm:$0xff]  ;;  %v595_v36 = vmul.bf16 %v591_v28, %v2321_v5  ;;  %v593_v40 = vld [vmem:[%s2319_s21 + $0x98] sm:$0xff]  ;;  %v594_v41 = vld [vmem:[%s2319_s21 + $0xe0] sm:$0xff] }
  0x16   : > { %v2030_v17 = vcombine.high %v382_v11, %v383_v12  ;;  %v2029_v18 = vcombine.low %v382_v11, %v383_v12  ;;  %v596_v37 = vmul.bf16 %v592_v29, %v2323_v6  ;;  %v597_v47 = vmul.bf16 %v593_v40, %v2325_v7  ;;  %v758_v49 = vld [vmem:[%s2319_s21 + $0x10] sm:$0xff]  ;;  %v759_v50 = vld [vmem:[%s2319_s21 + $0x58] sm:$0xff]  ;;  %v760_v56 = vld [vmem:[%s2319_s21 + $0xa0] sm:$0xff] }
  0x17   : > { %v2032_v19 = vcombine.high %v384_v15, %v385_v16  ;;  %v2031_v20 = vcombine.low %v384_v15, %v385_v16  ;;  %v598_v48 = vmul.bf16 %v594_v41, %v2329_v10  ;;  %v762_v54 = vmul.bf16 %v758_v49, %v2321_v5  ;;  %v761_v57 = vld [vmem:[%s2319_s21 + $0xe8] sm:$0xff]  ;;  %v925_v62 = vld [vmem:[%s2319_s21 + $0x18] sm:$0xff]  ;;  %v926_v63 = vld [vmem:[%s2319_s21 + $0x60] sm:$0xff] }
  0x18   : > { %425 = vmatprep.subr.bf16.mxu0 %v2030_v17  ;;  %v2038_v46 = vcombine.high %v595_v36, %v596_v37  ;;  %v2037_v52 = vcombine.low %v595_v36, %v596_v37  ;;  %v763_v55 = vmul.bf16 %v759_v50, %v2323_v6  ;;  %v764_v60 = vmul.bf16 %v760_v56, %v2325_v7  ;;  %v927_v8 = vld [vmem:[%s2319_s21 + $0xa8] sm:$0xff]  ;;  %v928_v9 = vld [vmem:[%s2319_s21 + $0xf0] sm:$0xff]  ;;  %v1092_v15 = vld [vmem:[%s2319_s21 + $0x20] sm:$0xff] }
  0x19   : > { %426 = vmatpush1.bf16.msra.mxu0 %v2029_v18  ;;  %v2040_v53 = vcombine.high %v597_v47, %v598_v48  ;;  %v2039_v58 = vcombine.low %v597_v47, %v598_v48  ;;  %v765_v61 = vmul.bf16 %v761_v57, %v2329_v10  ;;  %v929_v3 = vmul.bf16 %v925_v62, %v2321_v5  ;;  %v1093_v16 = vld [vmem:[%s2319_s21 + $0x68] sm:$0xff]  ;;  %v1094_v22 = vld [vmem:[%s2319_s21 + $0xb0] sm:$0xff]  ;;  %v1095_v23 = vld [vmem:[%s2319_s21 + $0xf8] sm:$0xff] }
  0x1a   : > { %427 = vmatprep.subr.bf16.mxu0 %v2032_v19  ;;  %v2046_v59 = vcombine.high %v762_v54, %v763_v55  ;;  %v2045_v0 = vcombine.low %v762_v54, %v763_v55  ;;  %v930_v4 = vmul.bf16 %v926_v63, %v2323_v6  ;;  %v931_v13 = vmul.bf16 %v927_v8, %v2325_v7  ;;  %v1259_v29 = vld [vmem:[%s2319_s21 + $0x28] sm:$0xff]  ;;  %v1261_v36 = vld [vmem:[%s2319_s21 + $0xb8] sm:$0xff]  ;;  %v1262_v37 = vld [vmem:[%s2319_s21 + $0x100] sm:$0xff] }
  0x1b   : > { %v2048_v2 = vcombine.high %v764_v60, %v765_v61  ;;  %v2047_v11 = vcombine.low %v764_v60, %v765_v61  ;;  %v932_v14 = vmul.bf16 %v928_v9, %v2329_v10  ;;  %v1096_v19 = vmul.bf16 %v1092_v15, %v2321_v5  ;;  %v1428_v48 = vld [vmem:[%s2319_s21 + $0xc0] sm:$0xff]  ;;  %v1429_v49 = vld [vmem:[%s2319_s21 + $0x108] sm:$0xff]  ;;  %v1593_v55 = vld [vmem:[%s2319_s21 + $0x38] sm:$0xff] }
  0x1c   : > { %v2054_v12 = vcombine.high %v929_v3, %v930_v4  ;;  %v2053_v17 = vcombine.low %v929_v3, %v930_v4  ;;  %v1099_v28 = vmul.bf16 %v1095_v23, %v2329_v10  ;;  %v1265_v40 = vmul.bf16 %v1261_v36, %v2325_v7  ;;  %v1594_v56 = vld [vmem:[%s2319_s21 + $0x80] sm:$0xff]  ;;  %v1595_v61 = vld [vmem:[%s2319_s21 + $0xc8] sm:$0xff]  ;;  %v1596_v62 = vld [vmem:[%s2319_s21 + $0x110] sm:$0xff] }
  0x1d   : > { %428 = vmatpush1.bf16.msra.mxu0 %v2031_v20  ;;  %v2056_v18 = vcombine.high %v931_v13, %v932_v14  ;;  %v1097_v20 = vmul.bf16 %v1093_v16, %v2323_v6  ;;  %v1266_v41 = vmul.bf16 %v1262_v37, %v2329_v10  ;;  %v1433_v54 = vmul.bf16 %v1429_v49, %v2329_v10  ;;  %v1760_v4 = vld [vmem:[%s2319_s21 + $0x40] sm:$0xff]  ;;  %v1761_v8 = vld [vmem:[%s2319_s21 + $0x88] sm:$0xff]  ;;  %v1763_v15 = vld [vmem:[%s2319_s21 + $0x118] sm:$0xff] }
  0x1e   : > { %v1598_v60 = vmul.bf16 %v1594_v56, %v2323_v6  ;;  %v1600_v3 = vmul.bf16 %v1596_v62, %v2329_v10 }
  0x1f   : > { %v2071_v50 = vcombine.low %v1265_v40, %v1266_v41 }
  0x20   : > { %2033 = vmatmul.mubr.msk.bf16.vlgmr.msra.gmra.mrb[0].mxu0 %vm421_vm0, %v2340_v21 }
  0x21   : > { %700 = vmatprep.mubr.bf16.mxu0 %v2231_v1 }
  0x88   : > { %v2351_v24 = vpop.permute.xlu0 %388 }
  0x8c   : > { %v2356_v30 = vpop.permute.xlu0 %393 }
  0xf3   : > { %v459_v25 = vpop.f32.mrb[0].mxu0 }
  0xf4   : > { %v460_v26 = vadd.f32 %v459_v25, %v2351_v24  ;;  %v461_v27 = vpop.f32.mrb[1].mxu0  ;;  %v2055_v25 = vcombine.low %v931_v13, %v932_v14  ;;  %v1765_v13 = vmul.bf16 %v1761_v8, %v2323_v6  ;;  %v1762_v14 = vld [vmem:[%s2319_s21 + $0xd0] sm:$0xff] }
  0xf5   : > { %v462_v31 = vadd.f32 %v461_v27, %v2351_v24  ;;  %v463_v32 = vpop.f32.mrb[2].mxu0  ;;  %v1098_v27 = vmul.bf16 %v1094_v22, %v2325_v7  ;;  %v2454_v22 = vpop.permute.xlu1 %476 }
  0xf6   : > { %v464_v33 = vadd.f32 %v463_v32, %v2356_v30  ;;  %v465_v34 = vpop.f32.mrb[3].mxu0  ;;  %v468_v38 = vmax.f32 %v460_v26, 0.0  ;;  %v2062_v26 = vcombine.high %v1096_v19, %v1097_v20  ;;  %v2061_v32 = vcombine.low %v1096_v19, %v1097_v20 }
  0xf7   : > { %v466_v35 = vadd.f32 %v465_v34, %v2356_v30  ;;  %v469_v42 = vmax.f32 %v462_v31, 0.0  ;;  %v1260_v31 = vld [vmem:[%s2319_s21 + $0x70] sm:$0xff]  ;;  %v1263_v34 = vmul.bf16 %v1259_v29, %v2321_v5  ;;  %v1767_v19 = vmul.bf16 %v1763_v15, %v2329_v10 }
  0xf8   : > { %v470_v39 = vmax.f32 %v464_v33, 0.0  ;;  %v2064_v33 = vcombine.high %v1098_v27, %v1099_v28 }
  0xf9   : > { %v471_v43 = vmax.f32 %v466_v35, 0.0  ;;  %v1264_v35 = vmul.bf16 %v1260_v31, %v2323_v6 }
  0xfa   : > { %v472_v44 = vpack.c.bf16 %v470_v39, %v468_v38  ;;  %v2063_v38 = vcombine.low %v1098_v27, %v1099_v28  ;;  %v2458_v27 = vpop.permute.xlu1 %528 }
  0xfb   : > { %v473_v45 = vpack.c.bf16 %v471_v43, %v469_v42  ;;  %v2070_v39 = vcombine.high %v1263_v34, %v1264_v35  ;;  %v1426_v42 = vld [vmem:[%s2319_s21 + $0x30] sm:$0xff]  ;;  %v1427_v43 = vld [vmem:[%s2319_s21 + $0x78] sm:$0xff] }
  0xfc   : > { %v1431_v47 = vmul.bf16 %v1427_v43, %v2323_v6 }
  0xfd   : > { %483 = vmatprep.subr.bf16.mxu1 %v473_v45  ;;  %v2072_v45 = vcombine.high %v1265_v40, %v1266_v41 }
  0xfe   : > { %484 = vmatpush1.bf16.msra.mxu1 %v472_v44  ;;  %v2069_v44 = vcombine.low %v1263_v34, %v1264_v35 }
  0xff   : > { %619 = vmatprep.subr.bf16.mxu1 %v2038_v46  ;;  %v1430_v46 = vmul.bf16 %v1426_v42, %v2321_v5 }
 0x101   : > { %2034 = vmatmul.mubr.msk.bf16.vlgmr.msra.gmra.mrb[0].mxu1 %vm479_vm1, %v2372_v51  ;;  %v2077_v57 = vcombine.low %v1430_v46, %v1431_v47 }
 0x102   : > { %620 = vmatpush1.bf16.msra.mxu1 %v2037_v52  ;;  %651 = vmatprep.mubr.bf16.mxu1 %v2231_v1  ;;  %v2078_v52 = vcombine.high %v1430_v46, %v1431_v47 }
 0x103   : > { %621 = vmatprep.subr.bf16.mxu1 %v2040_v53  ;;  %v1432_v53 = vmul.bf16 %v1428_v48, %v2325_v7 }
 0x105   : > { %v2079_v63 = vcombine.low %v1432_v53, %v1433_v54 }
 0x106   : > { %622 = vmatpush1.bf16.msra.mxu1 %v2039_v58  ;;  %v2080_v58 = vcombine.high %v1432_v53, %v1433_v54  ;;  %v548_v54 = vpop.permute.xlu0 %547 }
 0x107   : > { %786 = vmatprep.subr.bf16.mxu1 %v2046_v59  ;;  %v1597_v59 = vmul.bf16 %v1593_v55, %v2321_v5 }
 0x109   : > { %2041 = vmatmul.mubr.msk.bf16.vlgmr.msra.gmra.mrb[4].mxu1 %vm421_vm0, %v2340_v21  ;;  %v2085_v9 = vcombine.low %v1597_v59, %v1598_v60 }
 0x10a   : > { %787 = vmatpush1.bf16.msra.mxu1 %v2045_v0  ;;  %818 = vmatprep.mubr.bf16.mxu1 %v2231_v1  ;;  %v2086_v0 = vcombine.high %v1597_v59, %v1598_v60 }
 0x10b   : > { %788 = vmatprep.subr.bf16.mxu1 %v2048_v2  ;;  %v1599_v2 = vmul.bf16 %v1595_v61, %v2325_v7 }
 0x10d   : > { %v2087_v16 = vcombine.low %v1599_v2, %v1600_v3 }
 0x10e   : > { %789 = vmatpush1.bf16.msra.mxu1 %v2047_v11  ;;  %v2088_v11 = vcombine.high %v1599_v2, %v1600_v3 }
 0x10f   : > { %953 = vmatprep.subr.bf16.mxu1 %v2054_v12  ;;  %v1764_v12 = vmul.bf16 %v1760_v4, %v2321_v5 }
 0x111   : > { %2049 = vmatmul.mubr.msk.bf16.vlgmr.msra.gmra.mrb[8].mxu1 %vm421_vm0, %v2340_v21  ;;  %v2093_v20 = vcombine.low %v1764_v12, %v1765_v13 }
 0x112   : > { %954 = vmatpush1.bf16.msra.mxu1 %v2053_v17  ;;  %985 = vmatprep.mubr.bf16.mxu1 %v2231_v1  ;;  %v2094_v17 = vcombine.high %v1764_v12, %v1765_v13 }
 0x113   : > { %955 = vmatprep.subr.bf16.mxu1 %v2056_v18  ;;  %v1766_v18 = vmul.bf16 %v1762_v14, %v2325_v7 }
 0x115   : > { %v2096_v5 = vcombine.high %v1766_v18, %v1767_v19  ;;  %v2095_v6 = vcombine.low %v1766_v18, %v1767_v19 }
 0x116   : > { %956 = vmatpush1.bf16.msra.mxu1 %v2055_v25 }
 0x117   : > { %1120 = vmatprep.subr.bf16.mxu1 %v2062_v26 }
 0x119   : > { %2057 = vmatmul.mubr.msk.bf16.vlgmr.msra.gmra.mrb[12].mxu1 %vm421_vm0, %v2340_v21 }
 0x11a   : > { %1121 = vmatpush1.bf16.msra.mxu1 %v2061_v32  ;;  %1152 = vmatprep.mubr.bf16.mxu1 %v2231_v1  ;;  %v550_v32 = vlaneseq }
 0x11b   : > { %1122 = vmatprep.subr.bf16.mxu1 %v2064_v33 }
 0x11c   : > { %v2463_v37 = vshrl.u32 %v550_v32, 7  ;;  %vm2515_vm2 = vcmp.lt.s32.totalorder %v550_v32, 256 }
 0x11e   : > { %1123 = vmatpush1.bf16.msra.mxu1 %v2063_v38  ;;  %v552_v49 = vsub.s32 0, %v2463_v37 }
 0x11f   : > { %1287 = vmatprep.subr.bf16.mxu1 %v2070_v39 }
 0x121   : > { %2065 = vmatmul.mubr.msk.bf16.vlgmr.msra.gmra.mrb[16].mxu1 %vm421_vm0, %v2340_v21 }
 0x122   : > { %1288 = vmatpush1.bf16.msra.mxu1 %v2069_v44  ;;  %1319 = vmatprep.mubr.bf16.mxu1 %v2231_v1 }
 0x123   : > { %1289 = vmatprep.subr.bf16.mxu1 %v2072_v45 }
 0x126   : > { %1290 = vmatpush1.bf16.msra.mxu1 %v2071_v50 }
 0x127   : > { %1454 = vmatprep.subr.bf16.mxu1 %v2078_v52 }
 0x129   : > { %2073 = vmatmul.mubr.msk.bf16.vlgmr.msra.gmra.mrb[20].mxu1 %vm421_vm0, %v2340_v21 }
 0x12a   : > { %1455 = vmatpush1.bf16.msra.mxu1 %v2077_v57  ;;  %1486 = vmatprep.mubr.bf16.mxu1 %v2231_v1 }
 0x12b   : > { %1456 = vmatprep.subr.bf16.mxu1 %v2080_v58 }
 0x12e   : > { %1457 = vmatpush1.bf16.msra.mxu1 %v2079_v63  ;;  %v2470_v63 = vrot.slane %v548_v54, %v552_v49 }
 0x12f   : > { %1621 = vmatprep.subr.bf16.mxu1 %v2086_v0 }
 0x131   : > { %2081 = vmatmul.mubr.msk.bf16.vlgmr.msra.gmra.mrb[24].mxu1 %vm421_vm0, %v2340_v21 }
 0x132   : > { %1622 = vmatpush1.bf16.msra.mxu1 %v2085_v9  ;;  %1653 = vmatprep.mubr.bf16.mxu1 %v2231_v1 }
 0x133   : > { %1623 = vmatprep.subr.bf16.mxu1 %v2088_v11 }
 0x136   : > { %1624 = vmatpush1.bf16.msra.mxu1 %v2087_v16 }
 0x137   : > { %1788 = vmatprep.subr.bf16.mxu1 %v2094_v17 }
 0x139   : > { %2089 = vmatmul.mubr.msk.bf16.vlgmr.msra.gmra.mrb[28].mxu1 %vm421_vm0, %v2340_v21 }
 0x13a   : > { %1789 = vmatpush1.bf16.msra.mxu1 %v2093_v20  ;;  %1820 = vmatprep.mubr.bf16.mxu1 %v2231_v1 }
 0x13b   : > { %1790 = vmatprep.subr.bf16.mxu1 %v2096_v5 }
 0x13e   : > { %1791 = vmatpush1.bf16.msra.mxu1 %v2095_v6 }
 0x141   : > { %2097 = vmatmul.mubr.msk.bf16.vlgmr.msra.gmra.mrb[32].mxu1 %vm421_vm0, %v2340_v21 }
 0x1d4   : > { %v517_v7 = vpop.f32.mrb[0].mxu1 }
 0x1d5   : > { %v518_v10 = vadd.f32 %v517_v7, %v2454_v22  ;;  %v519_v23 = vpop.f32.mrb[1].mxu1 }
 0x1d6   : > { %v520_v25 = vadd.f32 %v519_v23, %v2454_v22  ;;  %v521_v26 = vpop.f32.mrb[2].mxu1 }
 0x1d7   : > { %v524_v28 = vmax.f32 %v518_v10, 0.0  ;;  %v522_v29 = vpop.f32.mrb[3].mxu1 }
 0x1d8   : > { %v525_v31 = vmax.f32 %v520_v25, 0.0 }
 0x1d9   : > { %v531_v33 = vmul.f32 %v2458_v27, %v524_v28 }
 0x1da   : > { %v532_v34 = vmul.f32 %v2458_v27, %v525_v31 }
 0x1db   : > { %v533_v21 = vrot.slane %v531_v33, 4 }
 0x1dc   : > { %v539_v35 = vrot.slane %v532_v34, 4  ;;  %v653_v36 = vpop.f32.mrb[4].mxu1 }
 0x1dd   : > { %v534_v38 = vadd.f32 %v533_v21, %v531_v33  ;;  %v654_v39 = vadd.f32 %v653_v36, %v2351_v24  ;;  %v655_v40 = vpop.f32.mrb[5].mxu1 }
 0x1de   : > { %v540_v41 = vadd.f32 %v539_v35, %v532_v34  ;;  %v656_v42 = vadd.f32 %v655_v40, %v2351_v24  ;;  %v657_v43 = vpop.f32.mrb[6].mxu1 }
 0x1df   : > { %v535_v44 = vrot.slane %v534_v38, 2  ;;  %v658_v45 = vadd.f32 %v657_v43, %v2356_v30  ;;  %v659_v46 = vpop.f32.mrb[7].mxu1  ;;  %v662_v52 = vmax.f32 %v654_v39, 0.0 }
 0x1e0   : > { %v541_v47 = vrot.slane %v540_v41, 2  ;;  %v660_v48 = vadd.f32 %v659_v46, %v2356_v30  ;;  %v663_v56 = vmax.f32 %v656_v42, 0.0 }
 0x1e1   : > { %v536_v50 = vadd.f32 %v535_v44, %v534_v38  ;;  %v664_v53 = vmax.f32 %v658_v45, 0.0 }
 0x1e2   : > { %v542_v55 = vadd.f32 %v541_v47, %v540_v41  ;;  %v665_v57 = vmax.f32 %v660_v48, 0.0 }
 0x1e3   : > { %v537_v58 = vrot.slane %v536_v50, 1  ;;  %v666_v59 = vpack.c.bf16 %v664_v53, %v662_v52 }
 0x1e4   : > { %v543_v60 = vrot.slane %v542_v55, 1  ;;  %v667_v61 = vpack.c.bf16 %v665_v57, %v663_v56  ;;  %v820_v62 = vpop.f32.mrb[8].mxu1 }
 0x1e5   : > { %v538_v0 = vadd.f32 %v537_v58, %v536_v50  ;;  %v821_v2 = vadd.f32 %v820_v62, %v2351_v24  ;;  %v822_v3 = vpop.f32.mrb[9].mxu1 }
 0x1e6   : > { %v544_v4 = vadd.f32 %v543_v60, %v542_v55  ;;  %v823_v8 = vadd.f32 %v822_v3, %v2351_v24  ;;  %668 = vmatprep.subr.bf16.mxu0 %v667_v61  ;;  %v824_v9 = vpop.f32.mrb[10].mxu1  ;;  %v2232_v55 = vmov 1966171168  }
 0x1e7   : > { %v554_v11 = vadd.f32 %v2470_v63, %v538_v0  ;;  %v825_v12 = vadd.f32 %v824_v9, %v2356_v30  ;;  %669 = vmatpush1.bf16.msra.mxu0 %v666_v59  ;;  %v826_v13 = vpop.f32.mrb[11].mxu1  ;;  %v829_v17 = vmax.f32 %v821_v2, 0.0  ;;  %v572_v56 = vunpack.c.l.s4 %v2232_v55 }
 0x1e8   : > { %v555_v14 = vadd.f32 %v2470_v63, %v544_v4  ;;  %v827_v15 = vadd.f32 %v826_v13, %v2356_v30  ;;  %v830_v20 = vmax.f32 %v823_v8, 0.0 }
 0x1e9   : > { %v2035_v16 = vmul.f32 -1.442695, %v554_v11  ;;  %v831_v18 = vmax.f32 %v825_v12, 0.0  ;;  %v573_v2 = vunpack.c.0.s8 %v572_v56 }
 0x1ea   : > { %v2036_v19 = vmul.f32 -1.442695, %v555_v14  ;;  %v832_v5 = vmax.f32 %v827_v15, 0.0  ;;  %2042 = vmatmul.mubr.msk.bf16.vlgmr.msra.gmra.mrb[4].mxu0 %vm479_vm1, %v2372_v51 }
 0x1eb   : > { %2135 = vpow2.f32 %v2035_v16  ;;  %v833_v6 = vpack.c.bf16 %v831_v18, %v829_v17  ;;  %867 = vmatprep.mubr.bf16.mxu0 %v2231_v1  ;;  %v2500_v15 = vsub.s32 %v573_v2, %v2463_v37 }
 0x1ec   : > { %2137 = vpow2.f32 %v2036_v19  ;;  %v834_v7 = vpack.c.bf16 %v832_v5, %v830_v20  ;;  %v987_v10 = vpop.f32.mrb[12].mxu1 }
 0x1ed   : > { %v988_v23 = vadd.f32 %v987_v10, %v2351_v24  ;;  %v989_v25 = vpop.f32.mrb[13].mxu1 }
 0x1ee   : > { %v990_v26 = vadd.f32 %v989_v25, %v2351_v24  ;;  %835 = vmatprep.subr.bf16.mxu0 %v834_v7  ;;  %v991_v28 = vpop.f32.mrb[14].mxu1 }
 0x1ef   : > { %v992_v29 = vadd.f32 %v991_v28, %v2356_v30  ;;  %836 = vmatpush1.bf16.msra.mxu0 %v833_v6  ;;  %v993_v31 = vpop.f32.mrb[15].mxu1  ;;  %v996_v34 = vmax.f32 %v988_v23, 0.0 }
 0x1f0   : > { %v994_v33 = vadd.f32 %v993_v31, %v2356_v30  ;;  %v997_v35 = vmax.f32 %v990_v26, 0.0 }
 0x1f1   : > { %v998_v21 = vmax.f32 %v992_v29, 0.0 }
 0x1f2   : > { %v999_v36 = vmax.f32 %v994_v33, 0.0  ;;  %2050 = vmatmul.mubr.msk.bf16.vlgmr.msra.gmra.mrb[8].mxu0 %vm479_vm1, %v2372_v51 }
 0x1f3   : > { %v1000_v38 = vpack.c.bf16 %v998_v21, %v996_v34  ;;  %1034 = vmatprep.mubr.bf16.mxu0 %v2231_v1 }
 0x1f4   : > { %v1001_v39 = vpack.c.bf16 %v999_v36, %v997_v35  ;;  %v1154_v40 = vpop.f32.mrb[16].mxu1 }
 0x1f5   : > { %v2136_v41 = vpop.eup %2135  ;;  %v1155_v42 = vadd.f32 %v1154_v40, %v2351_v24  ;;  %v1156_v43 = vpop.f32.mrb[17].mxu1 }
 0x1f6   : > { %v2138_v44 = vpop.eup %2137  ;;  %v562_v45 = vadd.f32 1.0, %v2136_v41  ;;  %v1157_v46 = vadd.f32 %v1156_v43, %v2351_v24  ;;  %1002 = vmatprep.subr.bf16.mxu0 %v1001_v39  ;;  %v1158_v47 = vpop.f32.mrb[18].mxu1 }
 0x1f7   : > { %v563_v48 = vadd.f32 1.0, %v2138_v44  ;;  %v1159_v49 = vadd.f32 %v1158_v47, %v2356_v30  ;;  %1003 = vmatpush1.bf16.msra.mxu0 %v1000_v38  ;;  %v1160_v50 = vpop.f32.mrb[19].mxu1  ;;  %v1163_v53 = vmax.f32 %v1155_v42, 0.0 }
 0x1f8   : > { %2139 = vrcp.f32 %v562_v45  ;;  %v1161_v52 = vadd.f32 %v1160_v50, %v2356_v30  ;;  %v1164_v57 = vmax.f32 %v1157_v46, 0.0 }
 0x1f9   : > { %2141 = vrcp.f32 %v563_v48  ;;  %v1165_v54 = vmax.f32 %v1159_v49, 0.0 }
 0x1fa   : > { %v1166_v58 = vmax.f32 %v1161_v52, 0.0  ;;  %2058 = vmatmul.mubr.msk.bf16.vlgmr.msra.gmra.mrb[12].mxu0 %vm479_vm1, %v2372_v51 }
 0x1fb   : > { %v1167_v59 = vpack.c.bf16 %v1165_v54, %v1163_v53  ;;  %1201 = vmatprep.mubr.bf16.mxu0 %v2231_v1 }
 0x1fc   : > { %v1168_v60 = vpack.c.bf16 %v1166_v58, %v1164_v57  ;;  %v1321_v61 = vpop.f32.mrb[20].mxu1 }
 0x1fd   : > { %v1322_v62 = vadd.f32 %v1321_v61, %v2351_v24  ;;  %v1323_v0 = vpop.f32.mrb[21].mxu1 }
 0x1fe   : > { %v1324_v3 = vadd.f32 %v1323_v0, %v2351_v24  ;;  %1169 = vmatprep.subr.bf16.mxu0 %v1168_v60  ;;  %v1325_v4 = vpop.f32.mrb[22].mxu1 }
 0x1ff   : > { %v1326_v8 = vadd.f32 %v1325_v4, %v2356_v30  ;;  %1170 = vmatpush1.bf16.msra.mxu0 %v1167_v59  ;;  %v1327_v9 = vpop.f32.mrb[23].mxu1  ;;  %v1330_v12 = vmax.f32 %v1322_v62, 0.0 }
 0x200   : > { %v1328_v11 = vadd.f32 %v1327_v9, %v2356_v30  ;;  %v1331_v16 = vmax.f32 %v1324_v3, 0.0 }
 0x201   : > { %v1332_v13 = vmax.f32 %v1326_v8, 0.0 }
 0x202   : > { %v2140_v14 = vpop.eup %2139  ;;  %v1333_v17 = vmax.f32 %v1328_v11, 0.0  ;;  %2066 = vmatmul.mubr.msk.bf16.vlgmr.msra.gmra.mrb[16].mxu0 %vm479_vm1, %v2372_v51 }
 0x203   : > { %v2142_v18 = vpop.eup %2141  ;;  %v1334_v19 = vpack.c.bf16 %v1332_v13, %v1330_v12  ;;  %1368 = vmatprep.mubr.bf16.mxu0 %v2231_v1 }
 0x204   : > { %v570_v20 = vcombine.low %v2140_v14, %v2142_v18  ;;  %v1335_v5 = vpack.c.bf16 %v1333_v17, %v1331_v16  ;;  %v1488_v6 = vpop.f32.mrb[24].mxu1 }
 0x205   : > { %v1489_v7 = vadd.f32 %v1488_v6, %v2351_v24  ;;  %v1490_v10 = vpop.f32.mrb[25].mxu1 }
 0x206   : > { %v577_v23 = vrot.slane %v570_v20, %v2500_v15  ;;  %v1491_v37 = vadd.f32 %v1490_v10, %v2351_v24  ;;  %1336 = vmatprep.subr.bf16.mxu0 %v1335_v5  ;;  %v1492_v25 = vpop.f32.mrb[26].mxu1 }
 0x207   : > { %v1493_v28 = vadd.f32 %v1492_v25, %v2356_v30  ;;  %1337 = vmatpush1.bf16.msra.mxu0 %v1334_v19  ;;  %v1494_v29 = vpop.f32.mrb[27].mxu1  ;;  %v1497_v34 = vmax.f32 %v1489_v7, 0.0 }
 0x208   : > { %v584_v31 = vrot.slane %v577_v23, %v2500_v15  ;;  %v1495_v33 = vadd.f32 %v1494_v29, %v2356_v30  ;;  %v1498_v35 = vmax.f32 %v1491_v37, 0.0 }
 0x209   : > { %v1499_v21 = vmax.f32 %v1493_v28, 0.0 }
 0x20a   : > { %590 = vst.msk [vmem:[%s2512_s14] sm:$0x3] %vm2515_vm2, %v584_v31  ;;  %v1500_v36 = vmax.f32 %v1495_v33, 0.0  ;;  %2074 = vmatmul.mubr.msk.bf16.vlgmr.msra.gmra.mrb[20].mxu0 %vm479_vm1, %v2372_v51 }
 0x20b   : > { %v1501_v32 = vpack.c.bf16 %v1499_v21, %v1497_v34  ;;  %1535 = vmatprep.mubr.bf16.mxu0 %v2231_v1 }
 0x20c   : > { %v1502_v38 = vpack.c.bf16 %v1500_v36, %v1498_v35  ;;  %v1655_v39 = vpop.f32.mrb[28].mxu1 }
 0x20d   : > { %v1656_v40 = vadd.f32 %v1655_v39, %v2351_v24  ;;  %v1657_v41 = vpop.f32.mrb[29].mxu1 }
 0x20e   : > { %v1658_v42 = vadd.f32 %v1657_v41, %v2351_v24  ;;  %1503 = vmatprep.subr.bf16.mxu0 %v1502_v38  ;;  %v1659_v43 = vpop.f32.mrb[30].mxu1 }
 0x20f   : > { %v1660_v44 = vadd.f32 %v1659_v43, %v2356_v30  ;;  %1504 = vmatpush1.bf16.msra.mxu0 %v1501_v32  ;;  %v1661_v45 = vpop.f32.mrb[31].mxu1  ;;  %v1664_v47 = vmax.f32 %v1656_v40, 0.0 }
 0x210   : > { %v1662_v46 = vadd.f32 %v1661_v45, %v2356_v30  ;;  %v1665_v49 = vmax.f32 %v1658_v42, 0.0 }
 0x211   : > { %v1666_v48 = vmax.f32 %v1660_v44, 0.0 }
 0x212   : > { %v1667_v50 = vmax.f32 %v1662_v46, 0.0  ;;  %2082 = vmatmul.mubr.msk.bf16.vlgmr.msra.gmra.mrb[24].mxu0 %vm479_vm1, %v2372_v51 }
 0x213   : > { %v1668_v52 = vpack.c.bf16 %v1666_v48, %v1664_v47  ;;  %1702 = vmatprep.mubr.bf16.mxu0 %v2231_v1 }
 0x214   : > { %v1669_v53 = vpack.c.bf16 %v1667_v50, %v1665_v49  ;;  %v1822_v54 = vpop.f32.mrb[32].mxu1 }
 0x215   : > { %v1823_v55 = vadd.f32 %v1822_v54, %v2351_v24  ;;  %v1824_v56 = vpop.f32.mrb[33].mxu1 }
 0x216   : > { %v1825_v57 = vadd.f32 %v1824_v56, %v2351_v24  ;;  %1670 = vmatprep.subr.bf16.mxu0 %v1669_v53  ;;  %v1826_v58 = vpop.f32.mrb[34].mxu1 }
 0x217   : > { %v1827_v59 = vadd.f32 %v1826_v58, %v2356_v30  ;;  %1671 = vmatpush1.bf16.msra.mxu0 %v1668_v52  ;;  %v1828_v60 = vpop.f32.mrb[35].mxu1  ;;  %v1831_v62 = vmax.f32 %v1823_v55, 0.0 }
 0x218   : > { %v1829_v61 = vadd.f32 %v1828_v60, %v2356_v30  ;;  %v1832_v2 = vmax.f32 %v1825_v57, 0.0 }
 0x219   : > { %v1833_v0 = vmax.f32 %v1827_v59, 0.0 }
 0x21a   : > { %v1834_v3 = vmax.f32 %v1829_v61, 0.0  ;;  %2090 = vmatmul.mubr.msk.bf16.vlgmr.msra.gmra.mrb[28].mxu0 %vm479_vm1, %v2372_v51 }
 0x21b   : > { %v1835_v4 = vpack.c.bf16 %v1833_v0, %v1831_v62  ;;  %1869 = vmatprep.mubr.bf16.mxu0 %v2231_v1 }
 0x21c   : > { %v1836_v8 = vpack.c.bf16 %v1834_v3, %v1832_v2 }
 0x21e   : > { %1837 = vmatprep.subr.bf16.mxu0 %v1836_v8 }
 0x21f   : > { %1838 = vmatpush1.bf16.msra.mxu0 %v1835_v4 }
 0x222   : > { %2098 = vmatmul.mubr.msk.bf16.vlgmr.msra.gmra.mrb[32].mxu0 %vm479_vm1, %v2372_v51 }
 0x2bd   : > { %v702_v24 = vpop.f32.mrb[4].mxu0 }
 0x2be   : > { %v703_v9 = vadd.f32 %v702_v24, %v2454_v22  ;;  %v704_v30 = vpop.f32.mrb[5].mxu0 }
 0x2bf   : > { %v705_v11 = vadd.f32 %v704_v30, %v2454_v22  ;;  %v706_v12 = vpop.f32.mrb[6].mxu0 }
 0x2c0   : > { %v709_v13 = vmax.f32 %v703_v9, 0.0  ;;  %v707_v14 = vpop.f32.mrb[7].mxu0 }
 0x2c1   : > { %v710_v16 = vmax.f32 %v705_v11, 0.0 }
 0x2c2   : > { %v711_v17 = vmul.f32 %v709_v13, %v2458_v27 }
 0x2c3   : > { %v712_v1 = vmul.f32 %v710_v16, %v2458_v27 }
 0x2c4   : > { %v713_v18 = vrot.slane %v711_v17, 4 }
 0x2c5   : > { %v719_v19 = vrot.slane %v712_v1, 4  ;;  %v869_v20 = vpop.f32.mrb[8].mxu0 }
 0x2c6   : > { %v714_v5 = vadd.f32 %v713_v18, %v711_v17  ;;  %v870_v51 = vadd.f32 %v869_v20, %v2454_v22  ;;  %v871_v6 = vpop.f32.mrb[9].mxu0 }
 0x2c7   : > { %v720_v7 = vadd.f32 %v719_v19, %v712_v1  ;;  %v872_v10 = vadd.f32 %v871_v6, %v2454_v22  ;;  %v873_v23 = vpop.f32.mrb[10].mxu0 }
 0x2c8   : > { %v715_v37 = vrot.slane %v714_v5, 2  ;;  %v876_v25 = vmax.f32 %v870_v51, 0.0  ;;  %v874_v28 = vpop.f32.mrb[11].mxu0 }
 0x2c9   : > { %v721_v29 = vrot.slane %v720_v7, 2  ;;  %v877_v31 = vmax.f32 %v872_v10, 0.0 }
 0x2ca   : > { %v716_v33 = vadd.f32 %v715_v37, %v714_v5  ;;  %v878_v34 = vmul.f32 %v876_v25, %v2458_v27 }
 0x2cb   : > { %v722_v21 = vadd.f32 %v721_v29, %v720_v7  ;;  %v879_v35 = vmul.f32 %v877_v31, %v2458_v27 }
 0x2cc   : > { %v717_v36 = vrot.slane %v716_v33, 1  ;;  %v880_v32 = vrot.slane %v878_v34, 4 }
 0x2cd   : > { %v723_v38 = vrot.slane %v722_v21, 1  ;;  %v886_v39 = vrot.slane %v879_v35, 4  ;;  %v1036_v40 = vpop.f32.mrb[12].mxu0 }
 0x2ce   : > { %v718_v41 = vadd.f32 %v717_v36, %v716_v33  ;;  %v881_v42 = vadd.f32 %v880_v32, %v878_v34  ;;  %v1037_v43 = vadd.f32 %v1036_v40, %v2454_v22  ;;  %v1038_v44 = vpop.f32.mrb[13].mxu0 }
 0x2cf   : > { %v724_v45 = vadd.f32 %v723_v38, %v722_v21  ;;  %v887_v46 = vadd.f32 %v886_v39, %v879_v35  ;;  %v1039_v47 = vadd.f32 %v1038_v44, %v2454_v22  ;;  %v1040_v48 = vpop.f32.mrb[14].mxu0 }
 0x2d0   : > { %v725_v49 = vadd.f32 %v718_v41, %v2470_v63  ;;  %v882_v50 = vrot.slane %v881_v42, 2  ;;  %v1043_v52 = vmax.f32 %v1037_v43, 0.0  ;;  %v1041_v53 = vpop.f32.mrb[15].mxu0 }
 0x2d1   : > { %v726_v54 = vadd.f32 %v724_v45, %v2470_v63  ;;  %v888_v55 = vrot.slane %v887_v46, 2  ;;  %v1044_v56 = vmax.f32 %v1039_v47, 0.0 }
 0x2d2   : > { %v2043_v57 = vmul.f32 -1.442695, %v725_v49  ;;  %v883_v58 = vadd.f32 %v882_v50, %v881_v42  ;;  %v1045_v59 = vmul.f32 %v1043_v52, %v2458_v27 }
 0x2d3   : > { %v2044_v60 = vmul.f32 -1.442695, %v726_v54  ;;  %v889_v61 = vadd.f32 %v888_v55, %v887_v46  ;;  %v1046_v62 = vmul.f32 %v1044_v56, %v2458_v27 }
 0x2d4   : > { %2143 = vpow2.f32 %v2043_v57  ;;  %v884_v0 = vrot.slane %v883_v58, 1  ;;  %v1047_v2 = vrot.slane %v1045_v59, 4 }
 0x2d5   : > { %2145 = vpow2.f32 %v2044_v60  ;;  %v890_v3 = vrot.slane %v889_v61, 1  ;;  %v1053_v4 = vrot.slane %v1046_v62, 4  ;;  %v1203_v8 = vpop.f32.mrb[16].mxu0 }
 0x2d6   : > { %v885_v24 = vadd.f32 %v884_v0, %v883_v58  ;;  %v1048_v9 = vadd.f32 %v1047_v2, %v1045_v59  ;;  %v1204_v30 = vadd.f32 %v1203_v8, %v2454_v22  ;;  %v1205_v11 = vpop.f32.mrb[17].mxu0 }
 0x2d7   : > { %v891_v12 = vadd.f32 %v890_v3, %v889_v61  ;;  %v1054_v13 = vadd.f32 %v1053_v4, %v1046_v62  ;;  %v1206_v14 = vadd.f32 %v1205_v11, %v2454_v22  ;;  %v1207_v16 = vpop.f32.mrb[18].mxu0 }
 0x2d8   : > { %v892_v17 = vadd.f32 %v885_v24, %v2470_v63  ;;  %v1049_v1 = vrot.slane %v1048_v9, 2  ;;  %v1210_v18 = vmax.f32 %v1204_v30, 0.0  ;;  %v1208_v19 = vpop.f32.mrb[19].mxu0 }
 0x2d9   : > { %v893_v20 = vadd.f32 %v891_v12, %v2470_v63  ;;  %v1055_v5 = vrot.slane %v1054_v13, 2  ;;  %v1211_v51 = vmax.f32 %v1206_v14, 0.0 }
 0x2da   : > { %v2051_v6 = vmul.f32 -1.442695, %v892_v17  ;;  %v1050_v7 = vadd.f32 %v1049_v1, %v1048_v9  ;;  %v1212_v10 = vmul.f32 %v1210_v18, %v2458_v27 }
 0x2db   : > { %v2052_v23 = vmul.f32 -1.442695, %v893_v20  ;;  %v1056_v37 = vadd.f32 %v1055_v5, %v1054_v13  ;;  %v1213_v25 = vmul.f32 %v1211_v51, %v2458_v27 }
 0x2dc   : > { %2147 = vpow2.f32 %v2051_v6  ;;  %v1051_v28 = vrot.slane %v1050_v7, 1  ;;  %v1214_v29 = vrot.slane %v1212_v10, 4 }
 0x2dd   : > { %2149 = vpow2.f32 %v2052_v23  ;;  %v1057_v31 = vrot.slane %v1056_v37, 1  ;;  %v1220_v33 = vrot.slane %v1213_v25, 4  ;;  %v1370_v34 = vpop.f32.mrb[20].mxu0 }
 0x2de   : > { %v2144_v21 = vpop.eup %2143  ;;  %v1052_v35 = vadd.f32 %v1051_v28, %v1050_v7  ;;  %v1215_v36 = vadd.f32 %v1214_v29, %v1212_v10  ;;  %v1371_v32 = vadd.f32 %v1370_v34, %v2454_v22  ;;  %v1372_v38 = vpop.f32.mrb[21].mxu0 }
 0x2df   : > { %v2146_v39 = vpop.eup %2145  ;;  %v733_v40 = vadd.f32 1.0, %v2144_v21  ;;  %v1058_v41 = vadd.f32 %v1057_v31, %v1056_v37  ;;  %v1221_v42 = vadd.f32 %v1220_v33, %v1213_v25  ;;  %v1373_v43 = vadd.f32 %v1372_v38, %v2454_v22  ;;  %v1374_v44 = vpop.f32.mrb[22].mxu0 }
 0x2e0   : > { %v734_v45 = vadd.f32 1.0, %v2146_v39  ;;  %v1059_v46 = vadd.f32 %v1052_v35, %v2470_v63  ;;  %v1216_v47 = vrot.slane %v1215_v36, 2  ;;  %v1377_v48 = vmax.f32 %v1371_v32, 0.0  ;;  %v1375_v49 = vpop.f32.mrb[23].mxu0 }
 0x2e1   : > { %2151 = vrcp.f32 %v733_v40  ;;  %v1060_v50 = vadd.f32 %v1058_v41, %v2470_v63  ;;  %v1222_v52 = vrot.slane %v1221_v42, 2  ;;  %v1378_v53 = vmax.f32 %v1373_v43, 0.0 }
 0x2e2   : > { %2153 = vrcp.f32 %v734_v45  ;;  %v2059_v54 = vmul.f32 -1.442695, %v1059_v46  ;;  %v1217_v55 = vadd.f32 %v1216_v47, %v1215_v36  ;;  %v1379_v56 = vmul.f32 %v1377_v48, %v2458_v27 }
 0x2e3   : > { %v2060_v57 = vmul.f32 -1.442695, %v1060_v50  ;;  %v1223_v58 = vadd.f32 %v1222_v52, %v1221_v42  ;;  %v1380_v59 = vmul.f32 %v1378_v53, %v2458_v27 }
 0x2e4   : > { %2155 = vpow2.f32 %v2059_v54  ;;  %v1218_v60 = vrot.slane %v1217_v55, 1  ;;  %v1381_v61 = vrot.slane %v1379_v56, 4 }
 0x2e5   : > { %2157 = vpow2.f32 %v2060_v57  ;;  %v1224_v62 = vrot.slane %v1223_v58, 1  ;;  %v1387_v0 = vrot.slane %v1380_v59, 4  ;;  %v1537_v2 = vpop.f32.mrb[24].mxu0 }
 0x2e6   : > { %v2148_v3 = vpop.eup %2147  ;;  %v1219_v4 = vadd.f32 %v1218_v60, %v1217_v55  ;;  %v1382_v8 = vadd.f32 %v1381_v61, %v1379_v56  ;;  %v1538_v24 = vadd.f32 %v1537_v2, %v2454_v22  ;;  %v1539_v9 = vpop.f32.mrb[25].mxu0 }
 0x2e7   : > { %v2150_v30 = vpop.eup %2149  ;;  %v900_v11 = vadd.f32 1.0, %v2148_v3  ;;  %v1225_v12 = vadd.f32 %v1224_v62, %v1223_v58  ;;  %v1388_v13 = vadd.f32 %v1387_v0, %v1380_v59  ;;  %v1540_v14 = vadd.f32 %v1539_v9, %v2454_v22  ;;  %v1541_v16 = vpop.f32.mrb[26].mxu0 }
 0x2e8   : > { %v901_v17 = vadd.f32 1.0, %v2150_v30  ;;  %v1226_v1 = vadd.f32 %v1219_v4, %v2470_v63  ;;  %v1383_v18 = vrot.slane %v1382_v8, 2  ;;  %v1544_v19 = vmax.f32 %v1538_v24, 0.0  ;;  %v1542_v20 = vpop.f32.mrb[27].mxu0 }
 0x2e9   : > { %2159 = vrcp.f32 %v900_v11  ;;  %v1227_v5 = vadd.f32 %v1225_v12, %v2470_v63  ;;  %v1389_v51 = vrot.slane %v1388_v13, 2  ;;  %v1545_v6 = vmax.f32 %v1540_v14, 0.0 }
 0x2ea   : > { %2161 = vrcp.f32 %v901_v17  ;;  %v2067_v7 = vmul.f32 -1.442695, %v1226_v1  ;;  %v1384_v10 = vadd.f32 %v1383_v18, %v1382_v8  ;;  %v1546_v23 = vmul.f32 %v1544_v19, %v2458_v27 }
 0x2eb   : > { %v2152_v37 = vpop.eup %2151  ;;  %v2068_v25 = vmul.f32 -1.442695, %v1227_v5  ;;  %v1390_v28 = vadd.f32 %v1389_v51, %v1388_v13  ;;  %v1547_v29 = vmul.f32 %v1545_v6, %v2458_v27 }
 0x2ec   : > { %v2154_v31 = vpop.eup %2153  ;;  %2163 = vpow2.f32 %v2067_v7  ;;  %v1385_v33 = vrot.slane %v1384_v10, 1  ;;  %v1548_v34 = vrot.slane %v1546_v23, 4 }
 0x2ed   : > { %v741_v21 = vcombine.low %v2152_v37, %v2154_v31  ;;  %2165 = vpow2.f32 %v2068_v25  ;;  %v1391_v35 = vrot.slane %v1390_v28, 1  ;;  %v1554_v36 = vrot.slane %v1547_v29, 4  ;;  %v1704_v32 = vpop.f32.mrb[28].mxu0 }
 0x2ee   : > { %v2156_v38 = vpop.eup %2155  ;;  %v1386_v39 = vadd.f32 %v1385_v33, %v1384_v10  ;;  %v1549_v40 = vadd.f32 %v1548_v34, %v1546_v23  ;;  %v1705_v41 = vadd.f32 %v1704_v32, %v2454_v22  ;;  %v1706_v42 = vpop.f32.mrb[29].mxu0 }
 0x2ef   : > { %v2158_v43 = vpop.eup %2157  ;;  %v748_v44 = vrot.slane %v741_v21, %v2500_v15  ;;  %v1067_v45 = vadd.f32 1.0, %v2156_v38  ;;  %v1392_v46 = vadd.f32 %v1391_v35, %v1390_v28  ;;  %v1555_v47 = vadd.f32 %v1554_v36, %v1547_v29  ;;  %v1708_v48 = vpop.f32.mrb[30].mxu0 }
 0x2f0   : > { %v1068_v49 = vadd.f32 1.0, %v2158_v43  ;;  %v1393_v50 = vadd.f32 %v1386_v39, %v2470_v63  ;;  %v1550_v52 = vrot.slane %v1549_v40, 2  ;;  %v1711_v53 = vmax.f32 %v1705_v41, 0.0  ;;  %v1709_v54 = vpop.f32.mrb[31].mxu0 }
 0x2f1   : > { %v755_v55 = vrot.slane %v748_v44, %v2500_v15  ;;  %2167 = vrcp.f32 %v1067_v45  ;;  %v1394_v56 = vadd.f32 %v1392_v46, %v2470_v63  ;;  %v1556_v57 = vrot.slane %v1555_v47, 2 }
 0x2f2   : > { %2169 = vrcp.f32 %v1068_v49  ;;  %v2075_v58 = vmul.f32 -1.442695, %v1393_v50  ;;  %v1551_v59 = vadd.f32 %v1550_v52, %v1549_v40  ;;  %v1713_v60 = vmul.f32 %v1711_v53, %v2458_v27 }
 0x2f3   : > { %v2160_v61 = vpop.eup %2159  ;;  %757 = vst.msk [vmem:[%s2512_s14 + $0x2] sm:$0x3] %vm2515_vm2, %v755_v55  ;;  %v2076_v62 = vmul.f32 -1.442695, %v1394_v56  ;;  %v1557_v0 = vadd.f32 %v1556_v57, %v1555_v47  ;;  %v1707_v2 = vadd.f32 %v1706_v42, %v2454_v22 }
 0x2f4   : > { %v2162_v3 = vpop.eup %2161  ;;  %2171 = vpow2.f32 %v2075_v58  ;;  %v1552_v4 = vrot.slane %v1551_v59, 1  ;;  %v1715_v8 = vrot.slane %v1713_v60, 4 }
 0x2f5   : > { %v908_v24 = vcombine.low %v2160_v61, %v2162_v3  ;;  %2173 = vpow2.f32 %v2076_v62  ;;  %v1558_v9 = vrot.slane %v1557_v0, 1  ;;  %v1712_v30 = vmax.f32 %v1707_v2, 0.0  ;;  %v1871_v11 = vpop.f32.mrb[32].mxu0 }
 0x2f6   : > { %v2164_v12 = vpop.eup %2163  ;;  %v1553_v13 = vadd.f32 %v1552_v4, %v1551_v59  ;;  %v1716_v14 = vadd.f32 %v1715_v8, %v1713_v60  ;;  %v1872_v16 = vadd.f32 %v1871_v11, %v2454_v22  ;;  %v1873_v17 = vpop.f32.mrb[33].mxu0 }
 0x2f7   : > { %v2166_v1 = vpop.eup %2165  ;;  %v915_v18 = vrot.slane %v908_v24, %v2500_v15  ;;  %v1234_v19 = vadd.f32 1.0, %v2164_v12  ;;  %v1559_v20 = vadd.f32 %v1558_v9, %v1557_v0  ;;  %v1714_v5 = vmul.f32 %v1712_v30, %v2458_v27  ;;  %v1875_v51 = vpop.f32.mrb[34].mxu0 }
 0x2f8   : > { %v1235_v6 = vadd.f32 1.0, %v2166_v1  ;;  %v1560_v7 = vadd.f32 %v1553_v13, %v2470_v63  ;;  %v1717_v10 = vrot.slane %v1716_v14, 2  ;;  %v1878_v23 = vmax.f32 %v1872_v16, 0.0  ;;  %v1876_v37 = vpop.f32.mrb[35].mxu0 }
 0x2f9   : > { %v922_v25 = vrot.slane %v915_v18, %v2500_v15  ;;  %2175 = vrcp.f32 %v1234_v19  ;;  %v1561_v28 = vadd.f32 %v1559_v20, %v2470_v63  ;;  %v1721_v29 = vrot.slane %v1714_v5, 4 }
 0x2fa   : > { %2177 = vrcp.f32 %v1235_v6  ;;  %v2083_v31 = vmul.f32 -1.442695, %v1560_v7  ;;  %v1718_v33 = vadd.f32 %v1717_v10, %v1716_v14  ;;  %v1880_v34 = vmul.f32 %v1878_v23, %v2458_v27 }
 0x2fb   : > { %v2168_v21 = vpop.eup %2167  ;;  %924 = vst.msk [vmem:[%s2512_s14 + $0x4] sm:$0x3] %vm2515_vm2, %v922_v25  ;;  %v2084_v35 = vmul.f32 -1.442695, %v1561_v28  ;;  %v1722_v36 = vadd.f32 %v1721_v29, %v1714_v5  ;;  %v1874_v32 = vadd.f32 %v1873_v17, %v2454_v22 }
 0x2fc   : > { %v2170_v38 = vpop.eup %2169  ;;  %2179 = vpow2.f32 %v2083_v31  ;;  %v1719_v39 = vrot.slane %v1718_v33, 1  ;;  %v1882_v40 = vrot.slane %v1880_v34, 4 }
 0x2fd   : > { %v1075_v41 = vcombine.low %v2168_v21, %v2170_v38  ;;  %2181 = vpow2.f32 %v2084_v35  ;;  %v1723_v42 = vrot.slane %v1722_v36, 2  ;;  %v1879_v43 = vmax.f32 %v1874_v32, 0.0 }
 0x2fe   : > { %v2172_v44 = vpop.eup %2171  ;;  %v1720_v45 = vadd.f32 %v1719_v39, %v1718_v33  ;;  %v1883_v46 = vadd.f32 %v1882_v40, %v1880_v34 }
 0x2ff   : > { %v2174_v47 = vpop.eup %2173  ;;  %v1082_v48 = vrot.slane %v1075_v41, %v2500_v15  ;;  %v1401_v49 = vadd.f32 1.0, %v2172_v44  ;;  %v1724_v50 = vadd.f32 %v1723_v42, %v1722_v36  ;;  %v1881_v52 = vmul.f32 %v1879_v43, %v2458_v27 }
 0x300   : > { %v1402_v22 = vadd.f32 1.0, %v2174_v47  ;;  %v1727_v53 = vadd.f32 %v1720_v45, %v2470_v63  ;;  %v1884_v54 = vrot.slane %v1883_v46, 2 }
 0x301   : > { %v1089_v55 = vrot.slane %v1082_v48, %v2500_v15  ;;  %2183 = vrcp.f32 %v1401_v49  ;;  %v1725_v56 = vrot.slane %v1724_v50, 1  ;;  %v1888_v57 = vrot.slane %v1881_v52, 4 }
 0x302   : > { %2185 = vrcp.f32 %v1402_v22  ;;  %v2091_v58 = vmul.f32 -1.442695, %v1727_v53  ;;  %v1885_v59 = vadd.f32 %v1884_v54, %v1883_v46 }
 0x303   : > { %v2176_v60 = vpop.eup %2175  ;;  %1091 = vst.msk [vmem:[%s2512_s14 + $0x6] sm:$0x3] %vm2515_vm2, %v1089_v55  ;;  %v1726_v61 = vadd.f32 %v1725_v56, %v1724_v50  ;;  %v1889_v62 = vadd.f32 %v1888_v57, %v1881_v52 }
 0x304   : > { %v2178_v0 = vpop.eup %2177  ;;  %v1886_v27 = vrot.slane %v1885_v59, 1  ;;  %2187 = vpow2.f32 %v2091_v58 }
 0x305   : > { %v1242_v2 = vcombine.low %v2176_v60, %v2178_v0  ;;  %v1728_v3 = vadd.f32 %v1726_v61, %v2470_v63  ;;  %v1890_v4 = vrot.slane %v1889_v62, 2 }
 0x306   : > { %v2180_v8 = vpop.eup %2179  ;;  %v1887_v24 = vadd.f32 %v1886_v27, %v1885_v59 }
 0x307   : > { %v2182_v9 = vpop.eup %2181  ;;  %v1249_v30 = vrot.slane %v1242_v2, %v2500_v15  ;;  %v1568_v11 = vadd.f32 1.0, %v2180_v8  ;;  %v2092_v12 = vmul.f32 -1.442695, %v1728_v3  ;;  %v1891_v13 = vadd.f32 %v1890_v4, %v1889_v62 }
 0x308   : > { %v1569_v14 = vadd.f32 1.0, %v2182_v9  ;;  %v1894_v16 = vadd.f32 %v1887_v24, %v2470_v63 }
 0x309   : > { %v1256_v17 = vrot.slane %v1249_v30, %v2500_v15  ;;  %2189 = vrcp.f32 %v1568_v11  ;;  %v1892_v1 = vrot.slane %v1891_v13, 1 }
 0x30a   : > { %2191 = vrcp.f32 %v1569_v14  ;;  %v2099_v18 = vmul.f32 -1.442695, %v1894_v16 }
 0x30b   : > { %v2184_v19 = vpop.eup %2183  ;;  %1258 = vst.msk [vmem:[%s2512_s14 + $0x8] sm:$0x3] %vm2515_vm2, %v1256_v17  ;;  %2193 = vpow2.f32 %v2092_v12  ;;  %v1893_v20 = vadd.f32 %v1892_v1, %v1891_v13 }
 0x30c   : > { %v2186_v5 = vpop.eup %2185  ;;  %2195 = vpow2.f32 %v2099_v18 }
 0x30d   : > { %v1409_v51 = vcombine.low %v2184_v19, %v2186_v5  ;;  %v1895_v6 = vadd.f32 %v1893_v20, %v2470_v63 }
 0x30e   : > { %v2188_v7 = vpop.eup %2187 }
 0x30f   : > { %v1416_v10 = vrot.slane %v1409_v51, %v2500_v15  ;;  %v2100_v23 = vmul.f32 -1.442695, %v1895_v6  ;;  %v1735_v25 = vadd.f32 1.0, %v2188_v7 }
 0x311   : > { %v1423_v37 = vrot.slane %v1416_v10, %v2500_v15  ;;  %2197 = vpow2.f32 %v2100_v23 }
 0x312   : > { %2199 = vrcp.f32 %v1735_v25 }
 0x313   : > { %v2190_v28 = vpop.eup %2189  ;;  %1425 = vst.msk [vmem:[%s2512_s14 + $0xa] sm:$0x3] %vm2515_vm2, %v1423_v37 }
 0x314   : > { %v2192_v29 = vpop.eup %2191 }
 0x315   : > { %v2194_v31 = vpop.eup %2193  ;;  %v1576_v33 = vcombine.low %v2190_v28, %v2192_v29 }
 0x316   : > { %v2196_v34 = vpop.eup %2195  ;;  %v1736_v21 = vadd.f32 1.0, %v2194_v31 }
 0x317   : > { %v1583_v63 = vrot.slane %v1576_v33, %v2500_v15  ;;  %v1902_v36 = vadd.f32 1.0, %v2196_v34 }
 0x318   : > { %2201 = vrcp.f32 %v1736_v21 }
 0x319   : > { %v1590_v35 = vrot.slane %v1583_v63, %v2500_v15  ;;  %2203 = vrcp.f32 %v1902_v36 }
 0x31b   : > { %1592 = vst.msk [vmem:[%s2512_s14 + $0xc] sm:$0x3] %vm2515_vm2, %v1590_v35  ;;  %v2198_v32 = vpop.eup %2197 }
 0x31c   : > { %v1903_v38 = vadd.f32 1.0, %v2198_v32  ;;  %v2200_v39 = vpop.eup %2199 }
 0x31e   : > { %2205 = vrcp.f32 %v1903_v38 }
 0x322   : > { %v2202_v40 = vpop.eup %2201 }
 0x323   : > { %v1743_v41 = vcombine.low %v2200_v39, %v2202_v40  ;;  %v2204_v43 = vpop.eup %2203 }
 0x325   : > { %v1750_v42 = vrot.slane %v1743_v41, %v2500_v15 }
 0x327   : > { %v1757_v44 = vrot.slane %v1750_v42, %v2500_v15 }
 0x328   : > { %v2206_v45 = vpop.eup %2205 }
 0x329   : > { %1759 = vst.msk [vmem:[%s2512_s14 + $0xe] sm:$0x3] %vm2515_vm2, %v1757_v44  ;;  %v1910_v46 = vcombine.low %v2204_v43, %v2206_v45 }
 0x32b   : > { %v1917_v47 = vrot.slane %v1910_v46, %v2500_v15 }
 0x32d   : > { %v1924_v48 = vrot.slane %v1917_v47, %v2500_v15 }
 0x32f   : > { %1926 = vst.msk [vmem:[%s2512_s14 + $0x10] sm:$0x3] %vm2515_vm2, %v1924_v48 }
 0x330 PF: > { %s20_s9 = sadd.s32 1, %s2229_s9   ;;  %s2652_s29 = smov %s2225_s30 }
 0x331   : > { %p17_p5 = scmp.ge.s32.totalorder %s20_s9, 4   ;;  %s2653_s30 = smov %s2655_s7 }
 0x333   :  { %19 = sbr.rel (!%p17_p5) target bundleno = 3 (0x3), region = 85 }

</bundles_post_ra>
